<compile_context>
chip_gen: v6e
topology: v6e:2x2x1
jax: 0.10.0
libtpu: 0.0.40
codegen_flags: <defaults>
</compile_context>

<pallas_src>
import jax
import jax.numpy as jnp
from jax.experimental import pallas as pl
from jax.experimental.pallas import tpu as pltpu

MAX_TILE_B = 8192   # upper bound on batch lanes per grid step
CHUNK = 512         # lanes per inner (vreg-resident) sub-chunk


def _round_up(x, m):
    return ((x + m - 1) // m) * m


def _pick_tile_b(batch):
    """Batch tile that scales with B but keeps >= 2 grid steps once B is large
    enough (so the "parallel" batch axis can use both v7x TensorCores)."""
    half = _round_up(max(1, -(-batch // 2)), CHUNK)   # ceil(B/2), chunk aligned
    return min(MAX_TILE_B, half)


def _pick_chunk(tile_b):
    for c in (CHUNK, 256, 128):
        if tile_b % c == 0:
            return min(c, tile_b)
    return tile_b


# ---------------------------------------------------------------------------
# One-time probe: stride-0 sublane-broadcast loads + sublane reduce.
# ---------------------------------------------------------------------------
_FAST_OPS = None


def _probe_kernel(x_ref, o_ref, s_ref):
    # (a) lane-slice staging into scratch, (b) stride-0 sublane-broadcast load
    # whose requested size exceeds the scratch sublane count, (c) sublane
    # reduce — exactly the constructs the main kernel's fast path relies on.
    s_ref[...] = x_ref[:, pl.ds(128, 128)]                       # (8, 128)
    bcast = s_ref[pl.ds(3, 16, stride=0), :]                     # (16, 128)
    red = jnp.sum(s_ref[...], axis=0, keepdims=True)             # (1, 128)
    o_ref[...] = bcast * 2.0 + red


def _fast_ops_supported():
    global _FAST_OPS
    if _FAST_OPS is not None:
        return _FAST_OPS
    try:
        x = jnp.arange(8 * 256, dtype=jnp.float32).reshape(8, 256)
        out = pl.pallas_call(
            _probe_kernel,
            out_shape=jax.ShapeDtypeStruct((16, 128), jnp.float32),
            scratch_shapes=[pltpu.VMEM((8, 128), jnp.float32)],
        )(x)
        out = jax.block_until_ready(out)
        want = (2.0 * x[3, 128:256])[None, :] + jnp.sum(
            x[:, 128:256], axis=0, keepdims=True)
        _FAST_OPS = bool(jnp.allclose(out, jnp.broadcast_to(want, (16, 128)),
                                      atol=1e-5, rtol=1e-5))
    except Exception:
        _FAST_OPS = False
    return _FAST_OPS


# ---------------------------------------------------------------------------
# Kernel
# ---------------------------------------------------------------------------
def _make_kernel(n_chunks, chunk, fast_ops):
    """Fused 4-layer MLP over one (features, tile_b) batch tile."""

    def bcast_row(src_ref, i, n_rows):
        # Row i of src_ref, broadcast over n_rows sublanes.
        if fast_ops:
            # Sublane broadcast done by the vld slots (stride-0 load), not XLU.
            return src_ref[pl.ds(i, n_rows, stride=0), :]
        # Conservative path: (1, chunk) row; the multiply broadcasts it.
        return src_ref[pl.ds(i, 1), :]

    def kernel(x_ref, w1_ref, b1_ref, w2_ref, b2_ref, w3_ref, b3_ref,
               w4t_ref, b4_ref, o_ref, xs_ref, h1_ref, h2_ref):
        w4t = w4t_ref[...]                                   # (8, 1), hoisted
        b4 = b4_ref[...]                                     # (1, 1), hoisted

        # Static unroll over lane sub-chunks: big DMA block per grid step,
        # vreg-resident working set per sub-chunk.  n_chunks is static and the
        # loop carries no state -> identical to lax.fori_loop(unroll=True).
        for c in range(n_chunks):
            cols = pl.ds(c * chunk, chunk)
            xs_ref[...] = x_ref[:, cols]                     # stage (4, chunk)

            # layer 1: 4 -> 8, ReLU
            acc = w1_ref[:, 0:1] * bcast_row(xs_ref, 0, 8)
            for i in range(1, 4):
                acc = acc + w1_ref[:, i:i + 1] * bcast_row(xs_ref, i, 8)
            h1_ref[...] = jnp.maximum(acc + b1_ref[...], 0.0)   # (8, chunk)

            # layer 2: 8 -> 16, ReLU
            acc = w2_ref[:, 0:1] * bcast_row(h1_ref, 0, 16)
            for i in range(1, 8):
                acc = acc + w2_ref[:, i:i + 1] * bcast_row(h1_ref, i, 16)
            h2_ref[...] = jnp.maximum(acc + b2_ref[...], 0.0)   # (16, chunk)

            # layer 3: 16 -> 8, ReLU (kept in vregs)
            acc = w3_ref[:, 0:1] * bcast_row(h2_ref, 0, 8)
            for i in range(1, 16):
                acc = acc + w3_ref[:, i:i + 1] * bcast_row(h2_ref, i, 8)
            h3 = jnp.maximum(acc + b3_ref[...], 0.0)            # (8, chunk)

            # layer 4: 8 -> 1, sigmoid
            if fast_ops:
                # One multiply + sublane reduce instead of 8 row products.
                z = jnp.sum(h3 * w4t, axis=0, keepdims=True) + b4
            else:
                z = w4t[0:1, 0:1] * h3[0:1, :]
                for i in range(1, 8):
                    z = z + w4t[i:i + 1, 0:1] * h3[i:i + 1, :]
                z = z + b4
            # sigmoid = 1 / (1 + exp(-z)); exp + reciprocal run on the EUP
            # slot.  approx=False keeps the exact 1e-5 reference check
            # (approx=True is fine for pure inference).
            o_ref[:, cols] = pl.reciprocal(1.0 + jnp.exp(-z), approx=False)

    return kernel


# ---------------------------------------------------------------------------
# Wrappers
# ---------------------------------------------------------------------------
def mlp_forward_feature_major(xt, params, *, tile_b=None):
    """xt: (4, B) feature-major input. Returns (1, B) float32.

    Fast path: no wrapper transpose; only the ragged tail tile is padded.
    """
    feat, B = xt.shape
    assert feat == 4, xt.shape
    if tile_b is None:
        tile_b = _pick_tile_b(B)
    assert tile_b % 128 == 0, "batch tile must be a multiple of the lane width"
    chunk = _pick_chunk(tile_b)
    n_chunks = tile_b // chunk
    n_tiles = pl.cdiv(B, tile_b)
    Bp = n_tiles * tile_b

    xt = xt.astype(jnp.float32)
    if Bp != B:
        xt = jnp.pad(xt, ((0, 0), (0, Bp - B)))      # pad only the ragged tail

    w4t = params["w4"].T                             # (8, 1) -> sublane reduce
    operands = (
        xt,
        params["w1"], params["b1"],
        params["w2"], params["b2"],
        params["w3"], params["b3"],
        w4t, params["b4"],
    )

    const_map = lambda i: (0, 0)     # weights/biases: one VMEM-resident block
    in_specs = [pl.BlockSpec((4, tile_b), lambda i: (0, i))]
    in_specs += [pl.BlockSpec(a.shape, const_map) for a in operands[1:]]

    kernel = _make_kernel(n_chunks, chunk, _fast_ops_supported())

    out = pl.pallas_call(
        kernel,
        out_shape=jax.ShapeDtypeStruct((1, Bp), jnp.float32),
        grid=(n_tiles,),
        in_specs=in_specs,
        out_specs=pl.BlockSpec((1, tile_b), lambda i: (0, i)),
        scratch_shapes=[
            pltpu.VMEM((4, chunk), jnp.float32),     # staged input rows
            pltpu.VMEM((8, chunk), jnp.float32),     # layer-1 activations
            pltpu.VMEM((16, chunk), jnp.float32),    # layer-2 activations
        ],
        compiler_params=pltpu.CompilerParams(
            dimension_semantics=("parallel",)),
    )(*operands)

    return out[:, :B]


def mlp_forward(x, params, *, tile_b=None):
    """x: (B, 4) float32 (PyTorch layout). Returns (B, 1) float32.

    NOTE: the (B,4)->(4,B) transpose is one extra XLA pass over the input;
    producers that can supply feature-major activations should call
    mlp_forward_feature_major directly and skip it.
    """
    out = mlp_forward_feature_major(x.T, params, tile_b=tile_b)
    return out.T


# ---------------------------------------------------------------------------
# Parameters + reference
# ---------------------------------------------------------------------------
def init_params(key):
    """PyTorch-style Linear init: U(-1/sqrt(fan_in), 1/sqrt(fan_in)).

    Weights in native (out, in) orientation; biases stored as (out, 1) columns
    so they broadcast over the batch/lane dim directly.
    """
    dims = [(8, 4), (16, 8), (8, 16), (1, 8)]        # (out, in) per layer
    params = {}
    for i, (out_d, in_d) in enumerate(dims, start=1):
        key, kw, kb = jax.random.split(key, 3)
        bound = 1.0 / (in_d ** 0.5)
        params[f"w{i}"] = jax.random.uniform(
            kw, (out_d, in_d), jnp.float32, minval=-bound, maxval=bound)
        params[f"b{i}"] = jax.random.uniform(
            kb, (out_d, 1), jnp.float32, minval=-bound, maxval=bound)
    return params


def _reference(x, p):
    h = jnp.maximum(x @ p["w1"].T + p["b1"][:, 0], 0.0)
    h = jnp.maximum(h @ p["w2"].T + p["b2"][:, 0], 0.0)
    h = jnp.maximum(h @ p["w3"].T + p["b3"][:, 0], 0.0)
    return jax.nn.sigmoid(h @ p["w4"].T + p["b4"][:, 0])


if __name__ == "__main__":
    key = jax.random.PRNGKey(0)
    key, kx1, kx2 = jax.random.split(key, 3)
    params = init_params(key)

    # One single-tile ragged batch and one multi-tile batch (exercises the
    # grid, the ragged-tail padding and the inner chunk loop).  For large-B
    # inference the tile auto-scales up to 8192 lanes per grid step.
    for kx, B in ((kx1, 300), (kx2, 3000)):
        x = jax.random.normal(kx, (B, 4), dtype=jnp.float32)
        out = jax.block_until_ready(mlp_forward(x, params))
        ref = _reference(x, params)
        assert out.shape == (B, 1), out.shape
        assert jnp.allclose(out, ref, atol=1e-5, rtol=1e-5), \
            f"mismatch vs reference at B={B}"

    print("KERNEL_OK")
</pallas_src>

<mosaic_0001>
module attributes {stable_mosaic.version = 11 : i64} {
  func.func @_probe_kernel(%arg0: memref<8x256xf32, #tpu.memory_space<vmem>>, %arg1: memref<16x128xf32, #tpu.memory_space<vmem>>, %arg2: memref<8x128xf32, #tpu.memory_space<vmem>>) attributes {dimension_semantics = [], scalar_prefetch = 0 : i64, scratch_operands = 1 : i64, tpu.core_type = #tpu.core_type<tc>} {
    %c0 = arith.constant 0 : index
    %c128 = arith.constant 128 : index
    %0 = vector.load %arg0[%c0, %c128] : memref<8x256xf32, #tpu.memory_space<vmem>>, vector<8x128xf32>
    %c0_0 = arith.constant 0 : index
    %c0_1 = arith.constant 0 : index
    %1 = vector.load %arg2[%c0_0, %c0_1] : memref<8x128xf32, #tpu.memory_space<vmem>>, vector<8x128xf32>
    tpu.vector_store %arg2[%c0_0, %c0_1], %0 {strides = array<i32>} : memref<8x128xf32, #tpu.memory_space<vmem>>, vector<8x128xf32>,
    %c3 = arith.constant 3 : index
    %c0_2 = arith.constant 0 : index
    %2 = tpu.strided_load %arg2[%c3, %c0_2] {strides = array<i32: 0, 1>} : memref<8x128xf32, #tpu.memory_space<vmem>>, vector<16x128xf32>
    %c0_3 = arith.constant 0 : index
    %c0_4 = arith.constant 0 : index
    %3 = vector.load %arg2[%c0_3, %c0_4] : memref<8x128xf32, #tpu.memory_space<vmem>>, vector<8x128xf32>
    %cst = arith.constant dense<0.000000e+00> : vector<128xf32>
    %4 = vector.multi_reduction <add>, %3, %cst [0] : vector<8x128xf32> to vector<128xf32>
    %5 = vector.shape_cast %4 : vector<128xf32> to vector<1x128xf32>
    %cst_5 = arith.constant 2.000000e+00 : f32
    %6 = vector.broadcast %cst_5 : f32 to vector<16x128xf32>
    %7 = arith.mulf %2, %6 : vector<16x128xf32>
    %8 = vector.broadcast %5 : vector<1x128xf32> to vector<16x128xf32>
    %9 = arith.addf %7, %8 : vector<16x128xf32>
    %c0_6 = arith.constant 0 : index
    %c0_7 = arith.constant 0 : index
    %10 = vector.load %arg1[%c0_6, %c0_7] : memref<16x128xf32, #tpu.memory_space<vmem>>, vector<16x128xf32>
    tpu.vector_store %arg1[%c0_6, %c0_7], %9 {strides = array<i32>} : memref<16x128xf32, #tpu.memory_space<vmem>>, vector<16x128xf32>,
    return
  }
}

module attributes {stable_mosaic.version = 11 : i64} {
  func.func @kernel(%arg0: i32, %arg1: memref<4x512xf32, #tpu.memory_space<vmem>>, %arg2: memref<8x4xf32, #tpu.memory_space<vmem>>, %arg3: memref<8x1xf32, #tpu.memory_space<vmem>>, %arg4: memref<16x8xf32, #tpu.memory_space<vmem>>, %arg5: memref<16x1xf32, #tpu.memory_space<vmem>>, %arg6: memref<8x16xf32, #tpu.memory_space<vmem>>, %arg7: memref<8x1xf32, #tpu.memory_space<vmem>>, %arg8: memref<8x1xf32, #tpu.memory_space<vmem>>, %arg9: memref<1x1xf32, #tpu.memory_space<vmem>>, %arg10: memref<1x512xf32, #tpu.memory_space<vmem>>, %arg11: memref<4x512xf32, #tpu.memory_space<vmem>>, %arg12: memref<8x512xf32, #tpu.memory_space<vmem>>, %arg13: memref<16x512xf32, #tpu.memory_space<vmem>>) attributes {dimension_semantics = [#tpu.dimension_semantics<parallel>], iteration_bounds = array<i64: 1>, scalar_prefetch = 0 : i64, scratch_operands = 3 : i64, tpu.core_type = #tpu.core_type<tc>, window_params = [{transform_indices = @transform_0, window_bounds = array<i64: 4, 512>}, {pipeline_mode = #tpu.pipeline_mode<synchronous>, transform_indices = @transform_1, window_bounds = array<i64: 8, 4>}, {pipeline_mode = #tpu.pipeline_mode<synchronous>, transform_indices = @transform_2, window_bounds = array<i64: 8, 1>}, {pipeline_mode = #tpu.pipeline_mode<synchronous>, transform_indices = @transform_3, window_bounds = array<i64: 16, 8>}, {pipeline_mode = #tpu.pipeline_mode<synchronous>, transform_indices = @transform_4, window_bounds = array<i64: 16, 1>}, {pipeline_mode = #tpu.pipeline_mode<synchronous>, transform_indices = @transform_5, window_bounds = array<i64: 8, 16>}, {pipeline_mode = #tpu.pipeline_mode<synchronous>, transform_indices = @transform_6, window_bounds = array<i64: 8, 1>}, {pipeline_mode = #tpu.pipeline_mode<synchronous>, transform_indices = @transform_7, window_bounds = array<i64: 8, 1>}, {pipeline_mode = #tpu.pipeline_mode<synchronous>, transform_indices = @transform_8, window_bounds = array<i64: 1, 1>}, {transform_indices = @transform_9, window_bounds = array<i64: 1, 512>}]} {
    %c0 = arith.constant 0 : index
    %c0_0 = arith.constant 0 : index
    %0 = vector.load %arg8[%c0, %c0_0] : memref<8x1xf32, #tpu.memory_space<vmem>>, vector<8x1xf32>
    %c0_1 = arith.constant 0 : index
    %c0_2 = arith.constant 0 : index
    %1 = vector.load %arg9[%c0_1, %c0_2] : memref<1x1xf32, #tpu.memory_space<vmem>>, vector<1x1xf32>
    %c0_3 = arith.constant 0 : index
    %c0_4 = arith.constant 0 : index
    %2 = vector.load %arg1[%c0_3, %c0_4] : memref<4x512xf32, #tpu.memory_space<vmem>>, vector<4x512xf32>
    %c0_5 = arith.constant 0 : index
    %c0_6 = arith.constant 0 : index
    %3 = vector.load %arg11[%c0_5, %c0_6] : memref<4x512xf32, #tpu.memory_space<vmem>>, vector<4x512xf32>
    tpu.vector_store %arg11[%c0_5, %c0_6], %2 {strides = array<i32>} : memref<4x512xf32, #tpu.memory_space<vmem>>, vector<4x512xf32>,
    %c0_7 = arith.constant 0 : index
    %c0_8 = arith.constant 0 : index
    %4 = vector.load %arg2[%c0_7, %c0_8] : memref<8x4xf32, #tpu.memory_space<vmem>>, vector<8x1xf32>
    %c0_9 = arith.constant 0 : index
    %c0_10 = arith.constant 0 : index
    %5 = vector.load %arg11[%c0_9, %c0_10] : memref<4x512xf32, #tpu.memory_space<vmem>>, vector<1x512xf32>
    %6 = vector.broadcast %4 : vector<8x1xf32> to vector<8x512xf32>
    %7 = vector.broadcast %5 : vector<1x512xf32> to vector<8x512xf32>
    %8 = arith.mulf %6, %7 : vector<8x512xf32>
    %c0_11 = arith.constant 0 : index
    %c1 = arith.constant 1 : index
    %9 = vector.load %arg2[%c0_11, %c1] : memref<8x4xf32, #tpu.memory_space<vmem>>, vector<8x1xf32>
    %c1_12 = arith.constant 1 : index
    %c0_13 = arith.constant 0 : index
    %10 = vector.load %arg11[%c1_12, %c0_13] : memref<4x512xf32, #tpu.memory_space<vmem>>, vector<1x512xf32>
    %11 = vector.broadcast %9 : vector<8x1xf32> to vector<8x512xf32>
    %12 = vector.broadcast %10 : vector<1x512xf32> to vector<8x512xf32>
    %13 = arith.mulf %11, %12 : vector<8x512xf32>
    %14 = arith.addf %8, %13 : vector<8x512xf32>
    %c0_14 = arith.constant 0 : index
    %c2 = arith.constant 2 : index
    %15 = vector.load %arg2[%c0_14, %c2] : memref<8x4xf32, #tpu.memory_space<vmem>>, vector<8x1xf32>
    %c2_15 = arith.constant 2 : index
    %c0_16 = arith.constant 0 : index
    %16 = vector.load %arg11[%c2_15, %c0_16] : memref<4x512xf32, #tpu.memory_space<vmem>>, vector<1x512xf32>
    %17 = vector.broadcast %15 : vector<8x1xf32> to vector<8x512xf32>
    %18 = vector.broadcast %16 : vector<1x512xf32> to vector<8x512xf32>
    %19 = arith.mulf %17, %18 : vector<8x512xf32>
    %20 = arith.addf %14, %19 : vector<8x512xf32>
    %c0_17 = arith.constant 0 : index
    %c3 = arith.constant 3 : index
    %21 = vector.load %arg2[%c0_17, %c3] : memref<8x4xf32, #tpu.memory_space<vmem>>, vector<8x1xf32>
    %c3_18 = arith.constant 3 : index
    %c0_19 = arith.constant 0 : index
    %22 = vector.load %arg11[%c3_18, %c0_19] : memref<4x512xf32, #tpu.memory_space<vmem>>, vector<1x512xf32>
    %23 = vector.broadcast %21 : vector<8x1xf32> to vector<8x512xf32>
    %24 = vector.broadcast %22 : vector<1x512xf32> to vector<8x512xf32>
    %25 = arith.mulf %23, %24 : vector<8x512xf32>
    %26 = arith.addf %20, %25 : vector<8x512xf32>
    %c0_20 = arith.constant 0 : index
    %c0_21 = arith.constant 0 : index
    %27 = vector.load %arg3[%c0_20, %c0_21] : memref<8x1xf32, #tpu.memory_space<vmem>>, vector<8x1xf32>
    %28 = vector.broadcast %27 : vector<8x1xf32> to vector<8x512xf32>
    %29 = arith.addf %26, %28 : vector<8x512xf32>
    %cst = arith.constant 0.000000e+00 : f32
    %30 = vector.broadcast %cst : f32 to vector<8x512xf32>
    %31 = arith.maximumf %29, %30 : vector<8x512xf32>
    %c0_22 = arith.constant 0 : index
    %c0_23 = arith.constant 0 : index
    %32 = vector.load %arg12[%c0_22, %c0_23] : memref<8x512xf32, #tpu.memory_space<vmem>>, vector<8x512xf32>
    tpu.vector_store %arg12[%c0_22, %c0_23], %31 {strides = array<i32>} : memref<8x512xf32, #tpu.memory_space<vmem>>, vector<8x512xf32>,
    %c0_24 = arith.constant 0 : index
    %c0_25 = arith.constant 0 : index
    %33 = vector.load %arg4[%c0_24, %c0_25] : memref<16x8xf32, #tpu.memory_space<vmem>>, vector<16x1xf32>
    %c0_26 = arith.constant 0 : index
    %c0_27 = arith.constant 0 : index
    %34 = vector.load %arg12[%c0_26, %c0_27] : memref<8x512xf32, #tpu.memory_space<vmem>>, vector<1x512xf32>
    %35 = vector.broadcast %33 : vector<16x1xf32> to vector<16x512xf32>
    %36 = vector.broadcast %34 : vector<1x512xf32> to vector<16x512xf32>
    %37 = arith.mulf %35, %36 : vector<16x512xf32>
    %c0_28 = arith.constant 0 : index
    %c1_29 = arith.constant 1 : index
    %38 = vector.load %arg4[%c0_28, %c1_29] : memref<16x8xf32, #tpu.memory_space<vmem>>, vector<16x1xf32>
    %c1_30 = arith.constant 1 : index
    %c0_31 = arith.constant 0 : index
    %39 = vector.load %arg12[%c1_30, %c0_31] : memref<8x512xf32, #tpu.memory_space<vmem>>, vector<1x512xf32>
    %40 = vector.broadcast %38 : vector<16x1xf32> to vector<16x512xf32>
    %41 = vector.broadcast %39 : vector<1x512xf32> to vector<16x512xf32>
    %42 = arith.mulf %40, %41 : vector<16x512xf32>
    %43 = arith.addf %37, %42 : vector<16x512xf32>
    %c0_32 = arith.constant 0 : index
    %c2_33 = arith.constant 2 : index
    %44 = vector.load %arg4[%c0_32, %c2_33] : memref<16x8xf32, #tpu.memory_space<vmem>>, vector<16x1xf32>
    %c2_34 = arith.constant 2 : index
    %c0_35 = arith.constant 0 : index
    %45 = vector.load %arg12[%c2_34, %c0_35] : memref<8x512xf32, #tpu.memory_space<vmem>>, vector<1x512xf32>
    %46 = vector.broadcast %44 : vector<16x1xf32> to vector<16x512xf32>
    %47 = vector.broadcast %45 : vector<1x512xf32> to vector<16x512xf32>
    %48 = arith.mulf %46, %47 : vector<16x512xf32>
    %49 = arith.addf %43, %48 : vector<16x512xf32>
    %c0_36 = arith.constant 0 : index
    %c3_37 = arith.constant 3 : index
    %50 = vector.load %arg4[%c0_36, %c3_37] : memref<16x8xf32, #tpu.memory_space<vmem>>, vector<16x1xf32>
    %c3_38 = arith.constant 3 : index
    %c0_39 = arith.constant 0 : index
    %51 = vector.load %arg12[%c3_38, %c0_39] : memref<8x512xf32, #tpu.memory_space<vmem>>, vector<1x512xf32>
    %52 = vector.broadcast %50 : vector<16x1xf32> to vector<16x512xf32>
    %53 = vector.broadcast %51 : vector<1x512xf32> to vector<16x512xf32>
    %54 = arith.mulf %52, %53 : vector<16x512xf32>
    %55 = arith.addf %49, %54 : vector<16x512xf32>
    %c0_40 = arith.constant 0 : index
    %c4 = arith.constant 4 : index
    %56 = vector.load %arg4[%c0_40, %c4] : memref<16x8xf32, #tpu.memory_space<vmem>>, vector<16x1xf32>
    %c4_41 = arith.constant 4 : index
    %c0_42 = arith.constant 0 : index
    %57 = vector.load %arg12[%c4_41, %c0_42] : memref<8x512xf32, #tpu.memory_space<vmem>>, vector<1x512xf32>
    %58 = vector.broadcast %56 : vector<16x1xf32> to vector<16x512xf32>
    %59 = vector.broadcast %57 : vector<1x512xf32> to vector<16x512xf32>
    %60 = arith.mulf %58, %59 : vector<16x512xf32>
    %61 = arith.addf %55, %60 : vector<16x512xf32>
    %c0_43 = arith.constant 0 : index
    %c5 = arith.constant 5 : index
    %62 = vector.load %arg4[%c0_43, %c5] : memref<16x8xf32, #tpu.memory_space<vmem>>, vector<16x1xf32>
    %c5_44 = arith.constant 5 : index
    %c0_45 = arith.constant 0 : index
    %63 = vector.load %arg12[%c5_44, %c0_45] : memref<8x512xf32, #tpu.memory_space<vmem>>, vector<1x512xf32>
    %64 = vector.broadcast %62 : vector<16x1xf32> to vector<16x512xf32>
    %65 = vector.broadcast %63 : vector<1x512xf32> to vector<16x512xf32>
    %66 = arith.mulf %64, %65 : vector<16x512xf32>
    %67 = arith.addf %61, %66 : vector<16x512xf32>
    %c0_46 = arith.constant 0 : index
    %c6 = arith.constant 6 : index
    %68 = vector.load %arg4[%c0_46, %c6] : memref<16x8xf32, #tpu.memory_space<vmem>>, vector<16x1xf32>
    %c6_47 = arith.constant 6 : index
    %c0_48 = arith.constant 0 : index
    %69 = vector.load %arg12[%c6_47, %c0_48] : memref<8x512xf32, #tpu.memory_space<vmem>>, vector<1x512xf32>
    %70 = vector.broadcast %68 : vector<16x1xf32> to vector<16x512xf32>
    %71 = vector.broadcast %69 : vector<1x512xf32> to vector<16x512xf32>
    %72 = arith.mulf %70, %71 : vector<16x512xf32>
    %73 = arith.addf %67, %72 : vector<16x512xf32>
    %c0_49 = arith.constant 0 : index
    %c7 = arith.constant 7 : index
    %74 = vector.load %arg4[%c0_49, %c7] : memref<16x8xf32, #tpu.memory_space<vmem>>, vector<16x1xf32>
    %c7_50 = arith.constant 7 : index
    %c0_51 = arith.constant 0 : index
    %75 = vector.load %arg12[%c7_50, %c0_51] : memref<8x512xf32, #tpu.memory_space<vmem>>, vector<1x512xf32>
    %76 = vector.broadcast %74 : vector<16x1xf32> to vector<16x512xf32>
    %77 = vector.broadcast %75 : vector<1x512xf32> to vector<16x512xf32>
    %78 = arith.mulf %76, %77 : vector<16x512xf32>
    %79 = arith.addf %73, %78 : vector<16x512xf32>
    %c0_52 = arith.constant 0 : index
    %c0_53 = arith.constant 0 : index
    %80 = vector.load %arg5[%c0_52, %c0_53] : memref<16x1xf32, #tpu.memory_space<vmem>>, vector<16x1xf32>
    %81 = vector.broadcast %80 : vector<16x1xf32> to vector<16x512xf32>
    %82 = arith.addf %79, %81 : vector<16x512xf32>
    %cst_54 = arith.constant 0.000000e+00 : f32
    %83 = vector.broadcast %cst_54 : f32 to vector<16x512xf32>
    %84 = arith.maximumf %82, %83 : vector<16x512xf32>
    %c0_55 = arith.constant 0 : index
    %c0_56 = arith.constant 0 : index
    %85 = vector.load %arg13[%c0_55, %c0_56] : memref<16x512xf32, #tpu.memory_space<vmem>>, vector<16x512xf32>
    tpu.vector_store %arg13[%c0_55, %c0_56], %84 {strides = array<i32>} : memref<16x512xf32, #tpu.memory_space<vmem>>, vector<16x512xf32>,
    %c0_57 = arith.constant 0 : index
    %c0_58 = arith.constant 0 : index
    %86 = vector.load %arg6[%c0_57, %c0_58] : memref<8x16xf32, #tpu.memory_space<vmem>>, vector<8x1xf32>
    %c0_59 = arith.constant 0 : index
    %c0_60 = arith.constant 0 : index
    %87 = vector.load %arg13[%c0_59, %c0_60] : memref<16x512xf32, #tpu.memory_space<vmem>>, vector<1x512xf32>
    %88 = vector.broadcast %86 : vector<8x1xf32> to vector<8x512xf32>
    %89 = vector.broadcast %87 : vector<1x512xf32> to vector<8x512xf32>
    %90 = arith.mulf %88, %89 : vector<8x512xf32>
    %c0_61 = arith.constant 0 : index
    %c1_62 = arith.constant 1 : index
    %91 = vector.load %arg6[%c0_61, %c1_62] : memref<8x16xf32, #tpu.memory_space<vmem>>, vector<8x1xf32>
    %c1_63 = arith.constant 1 : index
    %c0_64 = arith.constant 0 : index
    %92 = vector.load %arg13[%c1_63, %c0_64] : memref<16x512xf32, #tpu.memory_space<vmem>>, vector<1x512xf32>
    %93 = vector.broadcast %91 : vector<8x1xf32> to vector<8x512xf32>
    %94 = vector.broadcast %92 : vector<1x512xf32> to vector<8x512xf32>
    %95 = arith.mulf %93, %94 : vector<8x512xf32>
    %96 = arith.addf %90, %95 : vector<8x512xf32>
    %c0_65 = arith.constant 0 : index
    %c2_66 = arith.constant 2 : index
    %97 = vector.load %arg6[%c0_65, %c2_66] : memref<8x16xf32, #tpu.memory_space<vmem>>, vector<8x1xf32>
    %c2_67 = arith.constant 2 : index
    %c0_68 = arith.constant 0 : index
    %98 = vector.load %arg13[%c2_67, %c0_68] : memref<16x512xf32, #tpu.memory_space<vmem>>, vector<1x512xf32>
    %99 = vector.broadcast %97 : vector<8x1xf32> to vector<8x512xf32>
    %100 = vector.broadcast %98 : vector<1x512xf32> to vector<8x512xf32>
    %101 = arith.mulf %99, %100 : vector<8x512xf32>
    %102 = arith.addf %96, %101 : vector<8x512xf32>
    %c0_69 = arith.constant 0 : index
    %c3_70 = arith.constant 3 : index
    %103 = vector.load %arg6[%c0_69, %c3_70] : memref<8x16xf32, #tpu.memory_space<vmem>>, vector<8x1xf32>
    %c3_71 = arith.constant 3 : index
    %c0_72 = arith.constant 0 : index
    %104 = vector.load %arg13[%c3_71, %c0_72] : memref<16x512xf32, #tpu.memory_space<vmem>>, vector<1x512xf32>
    %105 = vector.broadcast %103 : vector<8x1xf32> to vector<8x512xf32>
    %106 = vector.broadcast %104 : vector<1x512xf32> to vector<8x512xf32>
    %107 = arith.mulf %105, %106 : vector<8x512xf32>
    %108 = arith.addf %102, %107 : vector<8x512xf32>
    %c0_73 = arith.constant 0 : index
    %c4_74 = arith.constant 4 : index
    %109 = vector.load %arg6[%c0_73, %c4_74] : memref<8x16xf32, #tpu.memory_space<vmem>>, vector<8x1xf32>
    %c4_75 = arith.constant 4 : index
    %c0_76 = arith.constant 0 : index
    %110 = vector.load %arg13[%c4_75, %c0_76] : memref<16x512xf32, #tpu.memory_space<vmem>>, vector<1x512xf32>
    %111 = vector.broadcast %109 : vector<8x1xf32> to vector<8x512xf32>
    %112 = vector.broadcast %110 : vector<1x512xf32> to vector<8x512xf32>
    %113 = arith.mulf %111, %112 : vector<8x512xf32>
    %114 = arith.addf %108, %113 : vector<8x512xf32>
    %c0_77 = arith.constant 0 : index
    %c5_78 = arith.constant 5 : index
    %115 = vector.load %arg6[%c0_77, %c5_78] : memref<8x16xf32, #tpu.memory_space<vmem>>, vector<8x1xf32>
    %c5_79 = arith.constant 5 : index
    %c0_80 = arith.constant 0 : index
    %116 = vector.load %arg13[%c5_79, %c0_80] : memref<16x512xf32, #tpu.memory_space<vmem>>, vector<1x512xf32>
    %117 = vector.broadcast %115 : vector<8x1xf32> to vector<8x512xf32>
    %118 = vector.broadcast %116 : vector<1x512xf32> to vector<8x512xf32>
    %119 = arith.mulf %117, %118 : vector<8x512xf32>
    %120 = arith.addf %114, %119 : vector<8x512xf32>
    %c0_81 = arith.constant 0 : index
    %c6_82 = arith.constant 6 : index
    %121 = vector.load %arg6[%c0_81, %c6_82] : memref<8x16xf32, #tpu.memory_space<vmem>>, vector<8x1xf32>
    %c6_83 = arith.constant 6 : index
    %c0_84 = arith.constant 0 : index
    %122 = vector.load %arg13[%c6_83, %c0_84] : memref<16x512xf32, #tpu.memory_space<vmem>>, vector<1x512xf32>
    %123 = vector.broadcast %121 : vector<8x1xf32> to vector<8x512xf32>
    %124 = vector.broadcast %122 : vector<1x512xf32> to vector<8x512xf32>
    %125 = arith.mulf %123, %124 : vector<8x512xf32>
    %126 = arith.addf %120, %125 : vector<8x512xf32>
    %c0_85 = arith.constant 0 : index
    %c7_86 = arith.constant 7 : index
    %127 = vector.load %arg6[%c0_85, %c7_86] : memref<8x16xf32, #tpu.memory_space<vmem>>, vector<8x1xf32>
    %c7_87 = arith.constant 7 : index
    %c0_88 = arith.constant 0 : index
    %128 = vector.load %arg13[%c7_87, %c0_88] : memref<16x512xf32, #tpu.memory_space<vmem>>, vector<1x512xf32>
    %129 = vector.broadcast %127 : vector<8x1xf32> to vector<8x512xf32>
    %130 = vector.broadcast %128 : vector<1x512xf32> to vector<8x512xf32>
    %131 = arith.mulf %129, %130 : vector<8x512xf32>
    %132 = arith.addf %126, %131 : vector<8x512xf32>
    %c0_89 = arith.constant 0 : index
    %c8 = arith.constant 8 : index
    %133 = vector.load %arg6[%c0_89, %c8] : memref<8x16xf32, #tpu.memory_space<vmem>>, vector<8x1xf32>
    %c8_90 = arith.constant 8 : index
    %c0_91 = arith.constant 0 : index
    %134 = vector.load %arg13[%c8_90, %c0_91] : memref<16x512xf32, #tpu.memory_space<vmem>>, vector<1x512xf32>
    %135 = vector.broadcast %133 : vector<8x1xf32> to vector<8x512xf32>
    %136 = vector.broadcast %134 : vector<1x512xf32> to vector<8x512xf32>
    %137 = arith.mulf %135, %136 : vector<8x512xf32>
    %138 = arith.addf %132, %137 : vector<8x512xf32>
    %c0_92 = arith.constant 0 : index
    %c9 = arith.constant 9 : index
    %139 = vector.load %arg6[%c0_92, %c9] : memref<8x16xf32, #tpu.memory_space<vmem>>, vector<8x1xf32>
    %c9_93 = arith.constant 9 : index
    %c0_94 = arith.constant 0 : index
    %140 = vector.load %arg13[%c9_93, %c0_94] : memref<16x512xf32, #tpu.memory_space<vmem>>, vector<1x512xf32>
    %141 = vector.broadcast %139 : vector<8x1xf32> to vector<8x512xf32>
    %142 = vector.broadcast %140 : vector<1x512xf32> to vector<8x512xf32>
    %143 = arith.mulf %141, %142 : vector<8x512xf32>
    %144 = arith.addf %138, %143 : vector<8x512xf32>
    %c0_95 = arith.constant 0 : index
    %c10 = arith.constant 10 : index
    %145 = vector.load %arg6[%c0_95, %c10] : memref<8x16xf32, #tpu.memory_space<vmem>>, vector<8x1xf32>
    %c10_96 = arith.constant 10 : index
    %c0_97 = arith.constant 0 : index
    %146 = vector.load %arg13[%c10_96, %c0_97] : memref<16x512xf32, #tpu.memory_space<vmem>>, vector<1x512xf32>
    %147 = vector.broadcast %145 : vector<8x1xf32> to vector<8x512xf32>
    %148 = vector.broadcast %146 : vector<1x512xf32> to vector<8x512xf32>
    %149 = arith.mulf %147, %148 : vector<8x512xf32>
    %150 = arith.addf %144, %149 : vector<8x512xf32>
    %c0_98 = arith.constant 0 : index
    %c11 = arith.constant 11 : index
    %151 = vector.load %arg6[%c0_98, %c11] : memref<8x16xf32, #tpu.memory_space<vmem>>, vector<8x1xf32>
    %c11_99 = arith.constant 11 : index
    %c0_100 = arith.constant 0 : index
    %152 = vector.load %arg13[%c11_99, %c0_100] : memref<16x512xf32, #tpu.memory_space<vmem>>, vector<1x512xf32>
    %153 = vector.broadcast %151 : vector<8x1xf32> to vector<8x512xf32>
    %154 = vector.broadcast %152 : vector<1x512xf32> to vector<8x512xf32>
    %155 = arith.mulf %153, %154 : vector<8x512xf32>
    %156 = arith.addf %150, %155 : vector<8x512xf32>
    %c0_101 = arith.constant 0 : index
    %c12 = arith.constant 12 : index
    %157 = vector.load %arg6[%c0_101, %c12] : memref<8x16xf32, #tpu.memory_space<vmem>>, vector<8x1xf32>
    %c12_102 = arith.constant 12 : index
    %c0_103 = arith.constant 0 : index
    %158 = vector.load %arg13[%c12_102, %c0_103] : memref<16x512xf32, #tpu.memory_space<vmem>>, vector<1x512xf32>
    %159 = vector.broadcast %157 : vector<8x1xf32> to vector<8x512xf32>
    %160 = vector.broadcast %158 : vector<1x512xf32> to vector<8x512xf32>
    %161 = arith.mulf %159, %160 : vector<8x512xf32>
    %162 = arith.addf %156, %161 : vector<8x512xf32>
    %c0_104 = arith.constant 0 : index
    %c13 = arith.constant 13 : index
    %163 = vector.load %arg6[%c0_104, %c13] : memref<8x16xf32, #tpu.memory_space<vmem>>, vector<8x1xf32>
    %c13_105 = arith.constant 13 : index
    %c0_106 = arith.constant 0 : index
    %164 = vector.load %arg13[%c13_105, %c0_106] : memref<16x512xf32, #tpu.memory_space<vmem>>, vector<1x512xf32>
    %165 = vector.broadcast %163 : vector<8x1xf32> to vector<8x512xf32>
    %166 = vector.broadcast %164 : vector<1x512xf32> to vector<8x512xf32>
    %167 = arith.mulf %165, %166 : vector<8x512xf32>
    %168 = arith.addf %162, %167 : vector<8x512xf32>
    %c0_107 = arith.constant 0 : index
    %c14 = arith.constant 14 : index
    %169 = vector.load %arg6[%c0_107, %c14] : memref<8x16xf32, #tpu.memory_space<vmem>>, vector<8x1xf32>
    %c14_108 = arith.constant 14 : index
    %c0_109 = arith.constant 0 : index
    %170 = vector.load %arg13[%c14_108, %c0_109] : memref<16x512xf32, #tpu.memory_space<vmem>>, vector<1x512xf32>
    %171 = vector.broadcast %169 : vector<8x1xf32> to vector<8x512xf32>
    %172 = vector.broadcast %170 : vector<1x512xf32> to vector<8x512xf32>
    %173 = arith.mulf %171, %172 : vector<8x512xf32>
    %174 = arith.addf %168, %173 : vector<8x512xf32>
    %c0_110 = arith.constant 0 : index
    %c15 = arith.constant 15 : index
    %175 = vector.load %arg6[%c0_110, %c15] : memref<8x16xf32, #tpu.memory_space<vmem>>, vector<8x1xf32>
    %c15_111 = arith.constant 15 : index
    %c0_112 = arith.constant 0 : index
    %176 = vector.load %arg13[%c15_111, %c0_112] : memref<16x512xf32, #tpu.memory_space<vmem>>, vector<1x512xf32>
    %177 = vector.broadcast %175 : vector<8x1xf32> to vector<8x512xf32>
    %178 = vector.broadcast %176 : vector<1x512xf32> to vector<8x512xf32>
    %179 = arith.mulf %177, %178 : vector<8x512xf32>
    %180 = arith.addf %174, %179 : vector<8x512xf32>
    %c0_113 = arith.constant 0 : index
    %c0_114 = arith.constant 0 : index
    %181 = vector.load %arg7[%c0_113, %c0_114] : memref<8x1xf32, #tpu.memory_space<vmem>>, vector<8x1xf32>
    %182 = vector.broadcast %181 : vector<8x1xf32> to vector<8x512xf32>
    %183 = arith.addf %180, %182 : vector<8x512xf32>
    %cst_115 = arith.constant 0.000000e+00 : f32
    %184 = vector.broadcast %cst_115 : f32 to vector<8x512xf32>
    %185 = arith.maximumf %183, %184 : vector<8x512xf32>
    %186 = vector.extract_strided_slice %0 {offsets = [0, 0], sizes = [1, 1], strides = [1, 1]} : vector<8x1xf32> to vector<1x1xf32>
    %187 = vector.extract_strided_slice %185 {offsets = [0, 0], sizes = [1, 512], strides = [1, 1]} : vector<8x512xf32> to vector<1x512xf32>
    %188 = vector.broadcast %186 : vector<1x1xf32> to vector<1x512xf32>
    %189 = arith.mulf %188, %187 : vector<1x512xf32>
    %190 = vector.extract_strided_slice %0 {offsets = [1, 0], sizes = [1, 1], strides = [1, 1]} : vector<8x1xf32> to vector<1x1xf32>
    %191 = vector.extract_strided_slice %185 {offsets = [1, 0], sizes = [1, 512], strides = [1, 1]} : vector<8x512xf32> to vector<1x512xf32>
    %192 = vector.broadcast %190 : vector<1x1xf32> to vector<1x512xf32>
    %193 = arith.mulf %192, %191 : vector<1x512xf32>
    %194 = arith.addf %189, %193 : vector<1x512xf32>
    %195 = vector.extract_strided_slice %0 {offsets = [2, 0], sizes = [1, 1], strides = [1, 1]} : vector<8x1xf32> to vector<1x1xf32>
    %196 = vector.extract_strided_slice %185 {offsets = [2, 0], sizes = [1, 512], strides = [1, 1]} : vector<8x512xf32> to vector<1x512xf32>
    %197 = vector.broadcast %195 : vector<1x1xf32> to vector<1x512xf32>
    %198 = arith.mulf %197, %196 : vector<1x512xf32>
    %199 = arith.addf %194, %198 : vector<1x512xf32>
    %200 = vector.extract_strided_slice %0 {offsets = [3, 0], sizes = [1, 1], strides = [1, 1]} : vector<8x1xf32> to vector<1x1xf32>
    %201 = vector.extract_strided_slice %185 {offsets = [3, 0], sizes = [1, 512], strides = [1, 1]} : vector<8x512xf32> to vector<1x512xf32>
    %202 = vector.broadcast %200 : vector<1x1xf32> to vector<1x512xf32>
    %203 = arith.mulf %202, %201 : vector<1x512xf32>
    %204 = arith.addf %199, %203 : vector<1x512xf32>
    %205 = vector.extract_strided_slice %0 {offsets = [4, 0], sizes = [1, 1], strides = [1, 1]} : vector<8x1xf32> to vector<1x1xf32>
    %206 = vector.extract_strided_slice %185 {offsets = [4, 0], sizes = [1, 512], strides = [1, 1]} : vector<8x512xf32> to vector<1x512xf32>
    %207 = vector.broadcast %205 : vector<1x1xf32> to vector<1x512xf32>
    %208 = arith.mulf %207, %206 : vector<1x512xf32>
    %209 = arith.addf %204, %208 : vector<1x512xf32>
    %210 = vector.extract_strided_slice %0 {offsets = [5, 0], sizes = [1, 1], strides = [1, 1]} : vector<8x1xf32> to vector<1x1xf32>
    %211 = vector.extract_strided_slice %185 {offsets = [5, 0], sizes = [1, 512], strides = [1, 1]} : vector<8x512xf32> to vector<1x512xf32>
    %212 = vector.broadcast %210 : vector<1x1xf32> to vector<1x512xf32>
    %213 = arith.mulf %212, %211 : vector<1x512xf32>
    %214 = arith.addf %209, %213 : vector<1x512xf32>
    %215 = vector.extract_strided_slice %0 {offsets = [6, 0], sizes = [1, 1], strides = [1, 1]} : vector<8x1xf32> to vector<1x1xf32>
    %216 = vector.extract_strided_slice %185 {offsets = [6, 0], sizes = [1, 512], strides = [1, 1]} : vector<8x512xf32> to vector<1x512xf32>
    %217 = vector.broadcast %215 : vector<1x1xf32> to vector<1x512xf32>
    %218 = arith.mulf %217, %216 : vector<1x512xf32>
    %219 = arith.addf %214, %218 : vector<1x512xf32>
    %220 = vector.extract_strided_slice %0 {offsets = [7, 0], sizes = [1, 1], strides = [1, 1]} : vector<8x1xf32> to vector<1x1xf32>
    %221 = vector.extract_strided_slice %185 {offsets = [7, 0], sizes = [1, 512], strides = [1, 1]} : vector<8x512xf32> to vector<1x512xf32>
    %222 = vector.broadcast %220 : vector<1x1xf32> to vector<1x512xf32>
    %223 = arith.mulf %222, %221 : vector<1x512xf32>
    %224 = arith.addf %219, %223 : vector<1x512xf32>
    %225 = vector.broadcast %1 : vector<1x1xf32> to vector<1x512xf32>
    %226 = arith.addf %224, %225 : vector<1x512xf32>
    %cst_116 = arith.constant 0.000000e+00 : f32
    %227 = vector.broadcast %cst_116 : f32 to vector<1x512xf32>
    %228 = arith.subf %227, %226 : vector<1x512xf32>
    %229 = math.exp %228 : vector<1x512xf32>
    %cst_117 = arith.constant 1.000000e+00 : f32
    %230 = vector.broadcast %cst_117 : f32 to vector<1x512xf32>
    %231 = arith.addf %230, %229 : vector<1x512xf32>
    %232 = tpu.reciprocal %231 : vector<1x512xf32> -> vector<1x512xf32>
    %c0_118 = arith.constant 0 : index
    %c0_119 = arith.constant 0 : index
    %233 = vector.load %arg10[%c0_118, %c0_119] : memref<1x512xf32, #tpu.memory_space<vmem>>, vector<1x512xf32>
    tpu.vector_store %arg10[%c0_118, %c0_119], %232 {strides = array<i32>} : memref<1x512xf32, #tpu.memory_space<vmem>>, vector<1x512xf32>,
    return
  }
  func.func @transform_0(%arg0: i32) -> (i32, i32) {
    %c0_i32 = arith.constant 0 : i32
    %c0_i32_0 = arith.constant 0 : i32
    return %c0_i32, %arg0 : i32, i32
  }
  func.func @transform_1(%arg0: i32) -> (i32, i32) {
    %c0_i32 = arith.constant 0 : i32
    %c0_i32_0 = arith.constant 0 : i32
    %c0_i32_1 = arith.constant 0 : i32
    return %c0_i32, %c0_i32_0 : i32, i32
  }
  func.func @transform_2(%arg0: i32) -> (i32, i32) {
    %c0_i32 = arith.constant 0 : i32
    %c0_i32_0 = arith.constant 0 : i32
    %c0_i32_1 = arith.constant 0 : i32
    return %c0_i32, %c0_i32_0 : i32, i32
  }
  func.func @transform_3(%arg0: i32) -> (i32, i32) {
    %c0_i32 = arith.constant 0 : i32
    %c0_i32_0 = arith.constant 0 : i32
    %c0_i32_1 = arith.constant 0 : i32
    return %c0_i32, %c0_i32_0 : i32, i32
  }
  func.func @transform_4(%arg0: i32) -> (i32, i32) {
    %c0_i32 = arith.constant 0 : i32
    %c0_i32_0 = arith.constant 0 : i32
    %c0_i32_1 = arith.constant 0 : i32
    return %c0_i32, %c0_i32_0 : i32, i32
  }
  func.func @transform_5(%arg0: i32) -> (i32, i32) {
    %c0_i32 = arith.constant 0 : i32
    %c0_i32_0 = arith.constant 0 : i32
    %c0_i32_1 = arith.constant 0 : i32
    return %c0_i32, %c0_i32_0 : i32, i32
  }
  func.func @transform_6(%arg0: i32) -> (i32, i32) {
    %c0_i32 = arith.constant 0 : i32
    %c0_i32_0 = arith.constant 0 : i32
    %c0_i32_1 = arith.constant 0 : i32
    return %c0_i32, %c0_i32_0 : i32, i32
  }
  func.func @transform_7(%arg0: i32) -> (i32, i32) {
    %c0_i32 = arith.constant 0 : i32
    %c0_i32_0 = arith.constant 0 : i32
    %c0_i32_1 = arith.constant 0 : i32
    return %c0_i32, %c0_i32_0 : i32, i32
  }
  func.func @transform_8(%arg0: i32) -> (i32, i32) {
    %c0_i32 = arith.constant 0 : i32
    %c0_i32_0 = arith.constant 0 : i32
    %c0_i32_1 = arith.constant 0 : i32
    return %c0_i32, %c0_i32_0 : i32, i32
  }
  func.func @transform_9(%arg0: i32) -> (i32, i32) {
    %c0_i32 = arith.constant 0 : i32
    %c0_i32_0 = arith.constant 0 : i32
    return %c0_i32, %arg0 : i32, i32
  }
}

</mosaic_0001>

<bundles_post_ra>
// kernel: tpu_custom_call.1
= control target key start
LH: loop header
LB: loop body
LE: loop exit
PB: predicated region body
PF: predicated region fallthrough
CT: control target
= control target key end

     0   :  { %6 = vsyncpa [#allocation4], 0  ;;  %s120_s0 = inlined_call_operand.hbm [shape: f32[8,256], index: 0, kind: input, shape index: {}]   ;;  %s121_s1 = inlined_call_operand.hbm [shape: f32[16,128], index: 1, kind: output, shape index: {}]  }
   0x1   :  { %7 = vsyncpa [#allocation5], 0  ;;  %s100_s6 = smov [#allocation3]  }
   0x2   :  { %s14_s7 = sshll.u32 %s100_s6, 4  ;;  %s15_s7 = int_to_ptr.vmem [resolvable:$true] %s14_s7 }
   0x3   :  { %s64_s8 = scalar_lea.vmem %s15_s7, 256  ;;  %p69_p1 = scmp.lt.s32.totalorder %s15_s7, %s15_s7 }
   0x4   :  { %p65_p0 = scmp.ne.s32.totalorder %s15_s7, %s64_s8  ;;  %p70_p2 = scmp.lt.s32.totalorder %s64_s8, %s64_s8 }
   0x6   :  { %p71_p3 = por %p70_p2, %p69_p1 }
   0x8   :  { %p72_p4 = pnand %p71_p3, %p65_p0 }
   0xa   :  { %75 = shalt.err (!%p72_p4)
}
   0xb   :  { %17 = dma.hbm_to_vmem [thread:$0]  %s120_s0, 256, %s15_s7, [#allocation4]  }
   0xc   :  { %96 = dma.done.wait [#allocation4], 256  }
   0xd   :  { %97 = vsyncadd [#allocation4], 4294967040  ;;  %v21_v0 = vld [vmem:[#allocation3 + $0x8] sm:$0xff]  ;;  %s101_s11 = smov [#allocation6]  }
   0xe   :  { %22 = vst [vmem:[#allocation2] sm:$0xff] %v21_v0  ;;  %v25_v1 = vrot.slane %v21_v0, 4  ;;  %s40_s12 = sshll.u32 %s101_s11, 4  ;;  %s41_s12 = int_to_ptr.vmem [resolvable:$true] %s40_s12 }
   0xf   :  { %s76_s13 = scalar_lea.vmem %s41_s12, 256  ;;  %p81_p6 = scmp.lt.s32.totalorder %s41_s12, %s41_s12 }
  0x10   :  { %v26_v2 = vadd.f32 %v25_v1, %v21_v0  ;;  %p77_p5 = scmp.ne.s32.totalorder %s41_s12, %s76_s13  ;;  %p82_p7 = scmp.lt.s32.totalorder %s76_s13, %s76_s13 }
  0x12   :  { %v27_v3 = vrot.slane %v26_v2, 2  ;;  %p83_p8 = por %p82_p7, %p81_p6 }
  0x14   :  { %v28_v4 = vadd.f32 %v27_v3, %v26_v2  ;;  %p84_p9 = pnand %p83_p8, %p77_p5 }
  0x15   :  { %v23_v5 = vld [vmem:[#allocation2 + $0x3] ss:$0 sm:$0xff] }
  0x16   :  { %v29_v6 = vrot.slane %v28_v4, 1  ;;  %v31_v7 = vmul.f32 2.0, %v23_v5 }
  0x18   :  { %v30_v8 = vadd.f32 %v29_v6, %v28_v4 }
  0x1a   :  { %v32_v9 = vadd.f32 %v31_v7, %v30_v8 }
  0x1c   :  { %33 = vst [vmem:[#allocation6] sm:$0xff] %v32_v9  ;;  %34 = vst [vmem:[#allocation6 + $0x8] sm:$0xff] %v32_v9 }
  0x1d   :  { %87 = shalt.err (!%p84_p9)
}
  0x1e   :  { %s102_s0 = smov 128   ;;  %s103_s14 = smov 8  }
  0x1f   :  { %46 = dma.vmem_to_hbm [thread:$0]  %s41_s12, 256, %s121_s1, [#allocation5], %s102_s0, %s102_s0, %s103_s14  }
  0x20   :  { %98 = dma.done.wait [#allocation5], 256  }
  0x21   :  { %99 = vsyncadd [#allocation5], 4294967040 }
  0x22   :  { %50 = vsyncpa [#allocation4], 1 }
  0x23   :  { %51 = vsyncpa [#allocation5], 1 }

// kernel: tpu_custom_call.1
= control target key start
LH: loop header
LB: loop body
LE: loop exit
PB: predicated region body
PF: predicated region fallthrough
CT: control target
= control target key end

     0   :  { %s1837_s0 = inlined_call_operand.vmem [shape: f32[4,512], index: 0, kind: input, shape index: {}]   ;;  %s1838_s1 = inlined_call_operand.vmem [shape: f32[8,4], index: 1, kind: input, shape index: {}]   ;;  %s1839_s2 = inlined_call_operand.vmem [shape: f32[8,1], index: 2, kind: input, shape index: {}]   ;;  %s1840_s3 = inlined_call_operand.vmem [shape: f32[16,8], index: 3, kind: input, shape index: {}]   ;;  %s1841_s4 = inlined_call_operand.vmem [shape: f32[16,1], index: 4, kind: input, shape index: {}]   ;;  %s1842_s5 = inlined_call_operand.vmem [shape: f32[8,16], index: 5, kind: input, shape index: {}]   ;;  %s1843_s6 = inlined_call_operand.vmem [shape: f32[8,1], index: 6, kind: input, shape index: {}]   ;;  %s1844_s7 = inlined_call_operand.vmem [shape: f32[8,1], index: 7, kind: input, shape index: {}]   ;;  %s1845_s8 = inlined_call_operand.<no memory space> [shape: f32[1,1], index: 8, kind: input, shape index: {}]   ;;  %s1846_s9 = inlined_call_operand.hbm [shape: f32[1,512], index: 9, kind: output, shape index: {}]  }
   0x1   :  { %v14_v0 = vstv %s1845_s8 }
   0x2   :  { %15 = vst [vmem:[#allocation5] sm:$0x1] %v14_v0 }
   0x3   :  { %v41_v1 = vld [vmem:[%s1838_s1] sm:$0xff]  ;;  %v1446_v2 = vmov 2   ;;  %v1447_v3 = vmov 1   ;;  %v38_v5 = vld [vmem:[%s1837_s0 + $0x8] sm:$0xff] }
   0x4   :  { %1372 = vset.pattern.permute.xlu1 %v1446_v2  ;;  %1370 = vset.pattern.permute.xlu0 %v1447_v3  ;;  %v37_v4 = vld [vmem:[%s1837_s0] sm:$0xff]  ;;  %40 = vst [vmem:[#allocation2 + $0x8] sm:$0xff] %v38_v5 }
   0x5   :  { %111 = vperm.xlu1 %1372, %v41_v1   ;;  %76 = vperm.xlu0 %1370, %v41_v1   ;;  %39 = vst [vmem:[#allocation2] sm:$0xff] %v37_v4 }
   0x6   :  { %16 = vsyncpa [#allocation7], 0  ;;  %v1448_v6 = vmov 3   ;;  %v1449_v7 = vmov 0   ;;  %v196_v8 = vld [vmem:[%s1840_s3] sm:$0xff]  ;;  %v197_v10 = vld [vmem:[%s1840_s3 + $0x8] sm:$0xff]  ;;  %v1847_v26 = vlaneseq }
   0x7   :  { %v178_v9 = vld [vmem:[%s1839_s2] sm:$0xff]  ;;  %v1450_v11 = vmov 4   ;;  %v1451_v12 = vmov 6   ;;  %v1452_v13 = vmov 5   ;;  %v1453_v14 = vmov 7   ;;  %v568_v21 = vld [vmem:[%s1841_s4 + $0x8] sm:$0xff] }
   0x8   :  { %v603_v15 = vld [vmem:[%s1842_s5] sm:$0xff]  ;;  %v1454_v17 = vmov 9   ;;  %v1455_v18 = vmov 12   ;;  %v1456_v19 = vmov 15   ;;  %v1457_v22 = vmov 8  }
   0x9   :  { %1373 = vset.pattern.permute.xlu1 %v1448_v6  ;;  %1371 = vset.pattern.permute.xlu0 %v1449_v7  ;;  %v567_v16 = vld [vmem:[%s1841_s4] sm:$0xff]  ;;  %v36_v20 = vld [vmem:[#allocation5] sm:$0x1]  ;;  %v1458_v23 = vmov 10   ;;  %v1459_v24 = vmov 11   ;;  %v1460_v25 = vmov 13  }
   0xa   :  { %146 = vperm.xlu1 %1373, %v41_v1   ;;  %45 = vperm.xlu0 %1371, %v41_v1   ;;  %v1560_v27 = vshrl.u32 %v1847_v26, 7  ;;  %v1461_v28 = vmov 14   ;;  %v1160_v34 = vld [vmem:[%s1843_s6] sm:$0xff] }
   0xb   :  { %v35_v48 = vld [vmem:[%s1844_s7] sm:$0xff]  ;;  %s1463_s7 = smov [#allocation6]  }
   0xc   :  { %1853 = vst [vmem:[#allocation9_spill] sm:$0xff] %v1560_v27  ;;  %v74_v29 = vld [vmem:[#allocation2 + $0x1] ss:$4 sm:$0xf]  ;;  %v1563_v30 = vsub.s32 0, %v1560_v27  ;;  %v1566_v31 = vsub.s32 1, %v1560_v27 }
   0xd   :  { %v1569_v32 = vsub.s32 2, %v1560_v27  ;;  %v1572_v33 = vsub.s32 3, %v1560_v27  ;;  %v42_v37 = vld [vmem:[#allocation2] ss:$4 sm:$0xf]  ;;  %s1344_s25 = sshll.u32 %s1463_s7, 4  ;;  %s1345_s25 = int_to_ptr.vmem [resolvable:$true] %s1344_s25 }
   0xe   :  { %1374 = vset.pattern.permute.xlu1 %v1449_v7  ;;  %201 = vperm.xlu0 %1371, %v196_v8   ;;  %v109_v38 = vld [vmem:[#allocation2 + $0x2] ss:$4 sm:$0xf]  ;;  %v83_v39 = vrot.slane %v74_v29, %v1563_v30  ;;  %v87_v40 = vrot.slane %v74_v29, %v1566_v31  ;;  %v144_v43 = vld [vmem:[#allocation2 + $0x3] ss:$4 sm:$0xf]  ;;  %v52_v44 = vrot.slane %v42_v37, %v1563_v30  ;;  %p1429_p1 = scmp.lt.s32.totalorder %s1345_s25, %s1345_s25 }
   0xf   :  { %181 = vperm.xlu1 %1374, %v178_v9   ;;  %1854 = vst [vmem:[#allocation10_spill] sm:$0xff] %v1569_v32  ;;  %1855 = vst [vmem:[#allocation11_spill] sm:$0xff] %v1572_v33  ;;  %v91_v41 = vrot.slane %v74_v29, %v1569_v32  ;;  %v95_v42 = vrot.slane %v74_v29, %v1572_v33  ;;  %v56_v45 = vrot.slane %v42_v37, %v1566_v31  ;;  %s1424_s26 = scalar_lea.vmem %s1345_s25, 64 }
  0x10   :  { %v60_v46 = vrot.slane %v42_v37, %v1569_v32  ;;  %v64_v47 = vrot.slane %v42_v37, %v1572_v33  ;;  %v118_v49 = vrot.slane %v109_v38, %v1563_v30  ;;  %v122_v50 = vrot.slane %v109_v38, %v1566_v31  ;;  %p1425_p0 = scmp.ne.s32.totalorder %s1345_s25, %s1424_s26  ;;  %p1430_p2 = scmp.lt.s32.totalorder %s1424_s26, %s1424_s26 }
  0x11   :  { %v126_v51 = vrot.slane %v109_v38, %v1569_v32  ;;  %v130_v52 = vrot.slane %v109_v38, %v1572_v33  ;;  %v153_v59 = vrot.slane %v144_v43, %v1563_v30  ;;  %v157_v60 = vrot.slane %v144_v43, %v1566_v31 }
  0x12   :  { %1381 = vset.pattern.permute.xlu0 %v1447_v3  ;;  %v161_v61 = vrot.slane %v144_v43, %v1569_v32  ;;  %v165_v62 = vrot.slane %v144_v43, %v1572_v33  ;;  %p1431_p3 = por %p1430_p2, %p1429_p1 }
  0x13   :  { %1375 = vset.pattern.permute.xlu1 %v1447_v3  ;;  %245 = vperm.xlu0 %1381, %v197_v10  }
  0x14   :  { %241 = vperm.xlu1 %1375, %v196_v8   ;;  %p1432_p4 = pnand %p1431_p3, %p1425_p0 }
  0x17   :  { %1382 = vset.pattern.permute.xlu0 %v1448_v6 }
  0x18   :  { %1376 = vset.pattern.permute.xlu1 %v1446_v2  ;;  %335 = vperm.xlu0 %1382, %v196_v8  }
  0x19   :  { %288 = vperm.xlu1 %1376, %v196_v8  }
  0x1c   :  { %339 = vperm.xlu0 %1382, %v197_v10  }
  0x1d   :  { %1377 = vset.pattern.permute.xlu1 %v1450_v11 }
  0x1e   :  { %382 = vperm.xlu1 %1377, %v196_v8  }
  0x20   :  { %1385 = vset.pattern.permute.xlu0 %v1451_v12 }
  0x21   :  { %476 = vperm.xlu0 %1385, %v196_v8  }
  0x22   :  { %1378 = vset.pattern.permute.xlu1 %v1452_v13 }
  0x23   :  { %429 = vperm.xlu1 %1378, %v196_v8  }
  0x25   :  { %480 = vperm.xlu0 %1385, %v197_v10  }
  0x27   :  { %1379 = vset.pattern.permute.xlu1 %v1453_v14 }
  0x28   :  { %523 = vperm.xlu1 %1379, %v196_v8  }
  0x29   :  { %1390 = vset.pattern.permute.xlu0 %v1449_v7 }
  0x2a   :  { %607 = vperm.xlu0 %1390, %v603_v15  }
  0x2c   :  { %1380 = vset.pattern.permute.xlu1 %v1449_v7 }
  0x2d   :  { %206 = vperm.xlu1 %1380, %v197_v10  }
  0x2e   :  { %1393 = vset.pattern.permute.xlu0 %v1448_v6 }
  0x2f   :  { %708 = vperm.xlu0 %1393, %v603_v15  }
  0x31   :  { %1383 = vset.pattern.permute.xlu1 %v1446_v2 }
  0x32   :  { %292 = vperm.xlu1 %1383, %v197_v10  }
  0x33   :  { %1396 = vset.pattern.permute.xlu0 %v1451_v12 }
  0x34   :  { %813 = vperm.xlu0 %1396, %v603_v15  }
  0x36   :  { %1384 = vset.pattern.permute.xlu1 %v1449_v7 }
  0x37   :  { %571 = vperm.xlu1 %1384, %v567_v16  }
  0x38   :  { %1399 = vset.pattern.permute.xlu0 %v1454_v17 }
  0x39   :  { %918 = vperm.xlu0 %1399, %v603_v15  }
  0x3b   :  { %1386 = vset.pattern.permute.xlu1 %v1450_v11 }
  0x3c   :  { %386 = vperm.xlu1 %1386, %v197_v10  }
  0x3d   :  { %1402 = vset.pattern.permute.xlu0 %v1455_v18 }
  0x3e   :  { %1023 = vperm.xlu0 %1402, %v603_v15  }
  0x40   :  { %1387 = vset.pattern.permute.xlu1 %v1452_v13 }
  0x41   :  { %433 = vperm.xlu1 %1387, %v197_v10  }
  0x42   :  { %1405 = vset.pattern.permute.xlu0 %v1456_v19 }
  0x43   :  { %1128 = vperm.xlu0 %1405, %v603_v15  }
  0x45   :  { %1388 = vset.pattern.permute.xlu1 %v1453_v14 }
  0x46   :  { %527 = vperm.xlu1 %1388, %v197_v10  }
  0x47   :  { %1407 = vset.pattern.permute.xlu0 %v1449_v7 }
  0x48   :  { %1273 = vperm.xlu0 %1407, %v36_v20  }
  0x4a   :  { %1389 = vset.pattern.permute.xlu1 %v1449_v7 }
  0x4b   :  { %576 = vperm.xlu1 %1389, %v568_v21  }
  0x4f   :  { %1391 = vset.pattern.permute.xlu1 %v1447_v3 }
  0x50   :  { %638 = vperm.xlu1 %1391, %v603_v15  }
  0x54   :  { %1392 = vset.pattern.permute.xlu1 %v1446_v2 }
  0x55   :  { %673 = vperm.xlu1 %1392, %v603_v15  }
  0x59   :  { %1394 = vset.pattern.permute.xlu1 %v1450_v11 }
  0x5a   :  { %743 = vperm.xlu1 %1394, %v603_v15  }
  0x5e   :  { %1395 = vset.pattern.permute.xlu1 %v1452_v13 }
  0x5f   :  { %778 = vperm.xlu1 %1395, %v603_v15  }
  0x63   :  { %1397 = vset.pattern.permute.xlu1 %v1453_v14 }
  0x64   :  { %848 = vperm.xlu1 %1397, %v603_v15  }
  0x68   :  { %1398 = vset.pattern.permute.xlu1 %v1457_v22 }
  0x69   :  { %883 = vperm.xlu1 %1398, %v603_v15  }
  0x6d   :  { %1400 = vset.pattern.permute.xlu1 %v1458_v23 }
  0x6e   :  { %953 = vperm.xlu1 %1400, %v603_v15  }
  0x72   :  { %1401 = vset.pattern.permute.xlu1 %v1459_v24 }
  0x73   :  { %988 = vperm.xlu1 %1401, %v603_v15  }
  0x77   :  { %1403 = vset.pattern.permute.xlu1 %v1460_v25 }
  0x78   :  { %1058 = vperm.xlu1 %1403, %v603_v15  }
  0x7c   :  { %1404 = vset.pattern.permute.xlu1 %v1461_v28 }
  0x7d   :  { %1093 = vperm.xlu1 %1404, %v603_v15  }
  0x80   :  { %v112_v35 = vpop.permute.xlu1 %111  ;;  %v77_v36 = vpop.permute.xlu0 %76 }
  0x81   :  { %1406 = vset.pattern.permute.xlu1 %v1449_v7  ;;  %v100_v53 = vmul.f32 %v83_v39, %v77_v36  ;;  %v101_v54 = vmul.f32 %v87_v40, %v77_v36  ;;  %v102_v55 = vmul.f32 %v91_v41, %v77_v36  ;;  %v103_v56 = vmul.f32 %v95_v42, %v77_v36 }
  0x82   :  { %1163 = vperm.xlu1 %1406, %v1160_v34   ;;  %v135_v3 = vmul.f32 %v118_v49, %v112_v35  ;;  %v136_v4 = vmul.f32 %v122_v50, %v112_v35  ;;  %v137_v5 = vmul.f32 %v126_v51, %v112_v35  ;;  %v138_v6 = vmul.f32 %v130_v52, %v112_v35 }
  0x85   :  { %v147_v57 = vpop.permute.xlu1 %146  ;;  %v46_v58 = vpop.permute.xlu0 %45 }
  0x86   :  { %1176 = vperm.xlu1 %1406, %v35_v48   ;;  %v69_v63 = vmul.f32 %v52_v44, %v46_v58  ;;  %v70_v0 = vmul.f32 %v56_v45, %v46_v58  ;;  %v71_v1 = vmul.f32 %v60_v46, %v46_v58  ;;  %v72_v2 = vmul.f32 %v64_v47, %v46_v58 }
  0x87   :  { %v170_v11 = vmul.f32 %v153_v59, %v147_v57  ;;  %v171_v12 = vmul.f32 %v157_v60, %v147_v57  ;;  %v172_v13 = vmul.f32 %v161_v61, %v147_v57  ;;  %v173_v14 = vmul.f32 %v165_v62, %v147_v57 }
  0x88   :  { %v104_v7 = vadd.f32 %v100_v53, %v69_v63  ;;  %v105_v8 = vadd.f32 %v101_v54, %v70_v0  ;;  %v106_v9 = vadd.f32 %v102_v55, %v71_v1  ;;  %v107_v10 = vadd.f32 %v103_v56, %v72_v2 }
  0x89   :  { %v202_v39 = vpop.permute.xlu0 %201 }
  0x8a   :  { %v182_v15 = vpop.permute.xlu1 %181  ;;  %v139_v16 = vadd.f32 %v135_v3, %v104_v7  ;;  %v140_v17 = vadd.f32 %v136_v4, %v105_v8  ;;  %v141_v18 = vadd.f32 %v137_v5, %v106_v9  ;;  %v142_v19 = vadd.f32 %v138_v6, %v107_v10 }
  0x8c   :  { %v174_v20 = vadd.f32 %v170_v11, %v139_v16  ;;  %v175_v21 = vadd.f32 %v171_v12, %v140_v17  ;;  %v176_v22 = vadd.f32 %v172_v13, %v141_v18  ;;  %v177_v23 = vadd.f32 %v173_v14, %v142_v19 }
  0x8e   :  { %v184_v24 = vadd.f32 %v182_v15, %v174_v20  ;;  %v185_v25 = vadd.f32 %v182_v15, %v175_v21  ;;  %v186_v28 = vadd.f32 %v182_v15, %v176_v22  ;;  %v187_v29 = vadd.f32 %v182_v15, %v177_v23  ;;  %v246_v41 = vpop.permute.xlu0 %245 }
  0x8f   :  { %v242_v34 = vpop.permute.xlu1 %241 }
  0x90   :  { %v188_v35 = vmax.f32 %v184_v24, 0.0  ;;  %v189_v36 = vmax.f32 %v185_v25, 0.0  ;;  %v190_v37 = vmax.f32 %v186_v28, 0.0  ;;  %v191_v38 = vmax.f32 %v187_v29, 0.0 }
  0x92   :  { %192 = vst [vmem:[#allocation3] sm:$0xff] %v188_v35  ;;  %193 = vst [vmem:[#allocation3 + $0x8] sm:$0xff] %v189_v36 }
  0x93   :  { %194 = vst [vmem:[#allocation3 + $0x10] sm:$0xff] %v190_v37  ;;  %195 = vst [vmem:[#allocation3 + $0x18] sm:$0xff] %v191_v38  ;;  %v336_v63 = vpop.permute.xlu0 %335 }
  0x94   :  { %v289_v40 = vpop.permute.xlu1 %288 }
  0x97   :  { %v340_v28 = vpop.permute.xlu0 %339 }
  0x99   :  { %v1597_v42 = vpop.permute.xlu1 %382 }
  0x9a   :  { %v198_v43 = vld [vmem:[#allocation3] ss:$8 sm:$0xf]  ;;  %v239_v44 = vld [vmem:[#allocation3 + $0x1] ss:$8 sm:$0xf] }
  0x9b   :  { %v1600_v45 = vrot.slane %v198_v43, %v1563_v30  ;;  %v1603_v46 = vrot.slane %v198_v43, %v1566_v31  ;;  %v1606_v47 = vrot.slane %v198_v43, %v1569_v32  ;;  %v1609_v48 = vrot.slane %v198_v43, %v1572_v33  ;;  %v286_v61 = vld [vmem:[#allocation3 + $0x2] ss:$8 sm:$0xf]  ;;  %v333_v0 = vld [vmem:[#allocation3 + $0x3] ss:$8 sm:$0xf] }
  0x9c   :  { %v252_v49 = vrot.slane %v239_v44, %v1563_v30  ;;  %v256_v50 = vrot.slane %v239_v44, %v1566_v31  ;;  %v260_v51 = vrot.slane %v239_v44, %v1569_v32  ;;  %v264_v52 = vrot.slane %v239_v44, %v1572_v33  ;;  %v380_v29 = vld [vmem:[#allocation3 + $0x4] ss:$8 sm:$0xf]  ;;  %v474_v38 = vld [vmem:[#allocation3 + $0x6] ss:$8 sm:$0xf] }
  0x9d   :  { %v230_v53 = vmul.f32 %v1600_v45, %v202_v39  ;;  %v231_v54 = vmul.f32 %v1603_v46, %v202_v39  ;;  %v232_v55 = vmul.f32 %v1606_v47, %v202_v39  ;;  %v233_v56 = vmul.f32 %v1609_v48, %v202_v39 }
  0x9e   :  { %v269_v57 = vmul.f32 %v252_v49, %v242_v34  ;;  %v270_v58 = vmul.f32 %v256_v50, %v242_v34  ;;  %v271_v59 = vmul.f32 %v260_v51, %v242_v34  ;;  %v272_v60 = vmul.f32 %v264_v52, %v242_v34  ;;  %v1619_v62 = vpop.permute.xlu1 %429 }
  0x9f   :  { %v1622_v5 = vrot.slane %v286_v61, %v1563_v30  ;;  %v1625_v6 = vrot.slane %v286_v61, %v1566_v31  ;;  %v1628_v7 = vrot.slane %v286_v61, %v1569_v32  ;;  %v1631_v8 = vrot.slane %v286_v61, %v1572_v33  ;;  %v427_v61 = vld [vmem:[#allocation3 + $0x5] ss:$8 sm:$0xf] }
  0xa0   :  { %v277_v1 = vadd.f32 %v269_v57, %v230_v53  ;;  %v278_v2 = vadd.f32 %v270_v58, %v231_v54  ;;  %v279_v3 = vadd.f32 %v271_v59, %v232_v55  ;;  %v280_v4 = vadd.f32 %v272_v60, %v233_v56 }
  0xa1   :  { %v346_v9 = vrot.slane %v333_v0, %v1563_v30  ;;  %v350_v10 = vrot.slane %v333_v0, %v1566_v31  ;;  %v354_v11 = vrot.slane %v333_v0, %v1569_v32  ;;  %v358_v12 = vrot.slane %v333_v0, %v1572_v33 }
  0xa2   :  { %v316_v13 = vmul.f32 %v1622_v5, %v289_v40  ;;  %v317_v14 = vmul.f32 %v1625_v6, %v289_v40  ;;  %v318_v15 = vmul.f32 %v1628_v7, %v289_v40  ;;  %v319_v16 = vmul.f32 %v1631_v8, %v289_v40 }
  0xa3   :  { %v1641_v17 = vpop.permute.xlu1 %523  ;;  %v363_v18 = vmul.f32 %v346_v9, %v336_v63  ;;  %v364_v19 = vmul.f32 %v350_v10, %v336_v63  ;;  %v365_v20 = vmul.f32 %v354_v11, %v336_v63  ;;  %v366_v21 = vmul.f32 %v358_v12, %v336_v63 }
  0xa4   :  { %v324_v22 = vadd.f32 %v316_v13, %v277_v1  ;;  %v325_v23 = vadd.f32 %v317_v14, %v278_v2  ;;  %v326_v24 = vadd.f32 %v318_v15, %v279_v3  ;;  %v327_v25 = vadd.f32 %v319_v16, %v280_v4  ;;  %v477_v3 = vpop.permute.xlu0 %476 }
  0xa5   :  { %v1643_v34 = vmul.f32 %v252_v49, %v246_v41  ;;  %v1645_v35 = vmul.f32 %v256_v50, %v246_v41  ;;  %v1647_v36 = vmul.f32 %v260_v51, %v246_v41  ;;  %v1649_v37 = vmul.f32 %v264_v52, %v246_v41 }
  0xa6   :  { %v371_v39 = vadd.f32 %v363_v18, %v324_v22  ;;  %v372_v40 = vadd.f32 %v364_v19, %v325_v23  ;;  %v373_v43 = vadd.f32 %v365_v20, %v326_v24  ;;  %v374_v44 = vadd.f32 %v366_v21, %v327_v25 }
  0xa7   :  { %v1652_v53 = vrot.slane %v380_v29, %v1563_v30  ;;  %v1655_v54 = vrot.slane %v380_v29, %v1566_v31  ;;  %v1658_v49 = vrot.slane %v380_v29, %v1569_v32  ;;  %v1661_v50 = vrot.slane %v380_v29, %v1572_v33 }
  0xa8   :  { %v207_v51 = vpop.permute.xlu1 %206  ;;  %v1664_v41 = vrot.slane %v474_v38, %v1563_v30  ;;  %v1667_v52 = vrot.slane %v474_v38, %v1566_v31  ;;  %v1670_v55 = vrot.slane %v474_v38, %v1569_v32  ;;  %v1673_v56 = vrot.slane %v474_v38, %v1572_v33 }
  0xa9   :  { %v410_v57 = vmul.f32 %v1652_v53, %v1597_v42  ;;  %v411_v58 = vmul.f32 %v1655_v54, %v1597_v42  ;;  %v412_v59 = vmul.f32 %v1658_v49, %v1597_v42  ;;  %v413_v60 = vmul.f32 %v1661_v50, %v1597_v42 }
  0xaa   :  { %v367_v63 = vmul.f32 %v346_v9, %v340_v28  ;;  %v368_v0 = vmul.f32 %v350_v10, %v340_v28  ;;  %v369_v1 = vmul.f32 %v354_v11, %v340_v28  ;;  %v370_v2 = vmul.f32 %v358_v12, %v340_v28  ;;  %v521_v9 = vld [vmem:[#allocation3 + $0x7] ss:$8 sm:$0xf] }
  0xab   :  { %v418_v4 = vadd.f32 %v410_v57, %v371_v39  ;;  %v419_v13 = vadd.f32 %v411_v58, %v372_v40  ;;  %v420_v14 = vadd.f32 %v412_v59, %v373_v43  ;;  %v421_v15 = vadd.f32 %v413_v60, %v374_v44 }
  0xac   :  { %v1684_v16 = vrot.slane %v427_v61, %v1563_v30  ;;  %v1687_v18 = vrot.slane %v427_v61, %v1566_v31  ;;  %v1690_v19 = vrot.slane %v427_v61, %v1569_v32  ;;  %v1693_v42 = vrot.slane %v427_v61, %v1572_v33 }
  0xad   :  { %v293_v10 = vpop.permute.xlu1 %292  ;;  %v504_v11 = vmul.f32 %v1664_v41, %v477_v3  ;;  %v505_v12 = vmul.f32 %v1667_v52, %v477_v3  ;;  %v506_v20 = vmul.f32 %v1670_v55, %v477_v3  ;;  %v507_v21 = vmul.f32 %v1673_v56, %v477_v3 }
  0xae   :  { %v457_v22 = vmul.f32 %v1684_v16, %v1619_v62  ;;  %v458_v23 = vmul.f32 %v1687_v18, %v1619_v62  ;;  %v459_v24 = vmul.f32 %v1690_v19, %v1619_v62  ;;  %v460_v25 = vmul.f32 %v1693_v42, %v1619_v62 }
  0xaf   :  { %v1708_v28 = vrot.slane %v521_v9, %v1563_v30  ;;  %v1711_v29 = vrot.slane %v521_v9, %v1566_v31  ;;  %v1714_v38 = vrot.slane %v521_v9, %v1569_v32  ;;  %v1717_v39 = vrot.slane %v521_v9, %v1572_v33 }
  0xb0   :  { %v465_v40 = vadd.f32 %v457_v22, %v418_v4  ;;  %v466_v43 = vadd.f32 %v458_v23, %v419_v13  ;;  %v467_v44 = vadd.f32 %v459_v24, %v420_v14  ;;  %v468_v57 = vadd.f32 %v460_v25, %v421_v15 }
  0xb1   :  { %v551_v58 = vmul.f32 %v1708_v28, %v1641_v17  ;;  %v552_v62 = vmul.f32 %v1711_v29, %v1641_v17  ;;  %v553_v59 = vmul.f32 %v1714_v38, %v1641_v17  ;;  %v554_v60 = vmul.f32 %v1717_v39, %v1641_v17 }
  0xb2   :  { %v572_v61 = vpop.permute.xlu1 %571  ;;  %v234_v3 = vmul.f32 %v1600_v45, %v207_v51  ;;  %v235_v4 = vmul.f32 %v1603_v46, %v207_v51  ;;  %v236_v13 = vmul.f32 %v1606_v47, %v207_v51  ;;  %v237_v14 = vmul.f32 %v1609_v48, %v207_v51 }
  0xb3   :  { %v320_v15 = vmul.f32 %v1622_v5, %v293_v10  ;;  %v321_v9 = vmul.f32 %v1625_v6, %v293_v10  ;;  %v322_v22 = vmul.f32 %v1628_v7, %v293_v10  ;;  %v323_v23 = vmul.f32 %v1631_v8, %v293_v10 }
  0xb4   :  { %v281_v24 = vadd.f32 %v1643_v34, %v234_v3  ;;  %v282_v17 = vadd.f32 %v1645_v35, %v235_v4  ;;  %v283_v45 = vadd.f32 %v1647_v36, %v236_v13  ;;  %v284_v46 = vadd.f32 %v1649_v37, %v237_v14 }
  0xb5   :  { %v512_v25 = vadd.f32 %v504_v11, %v465_v40  ;;  %v513_v47 = vadd.f32 %v505_v12, %v466_v43  ;;  %v514_v26 = vadd.f32 %v506_v20, %v467_v44  ;;  %v515_v48 = vadd.f32 %v507_v21, %v468_v57 }
  0xb6   :  { %v328_v51 = vadd.f32 %v320_v15, %v281_v24  ;;  %v329_v5 = vadd.f32 %v321_v9, %v282_v17  ;;  %v330_v27 = vadd.f32 %v322_v22, %v283_v45  ;;  %v331_v6 = vadd.f32 %v323_v23, %v284_v46 }
  0xb7   :  { %v387_v33 = vpop.permute.xlu1 %386  ;;  %v559_v7 = vadd.f32 %v551_v58, %v512_v25  ;;  %v560_v32 = vadd.f32 %v552_v62, %v513_v47  ;;  %v561_v8 = vadd.f32 %v553_v59, %v514_v26  ;;  %v562_v10 = vadd.f32 %v554_v60, %v515_v48 }
  0xb8   :  { %v375_v34 = vadd.f32 %v367_v63, %v328_v51  ;;  %v376_v3 = vadd.f32 %v368_v0, %v329_v5  ;;  %v377_v35 = vadd.f32 %v369_v1, %v330_v27  ;;  %v378_v4 = vadd.f32 %v370_v2, %v331_v6 }
  0xb9   :  { %v579_v36 = vadd.f32 %v572_v61, %v559_v7  ;;  %v580_v13 = vadd.f32 %v572_v61, %v560_v32  ;;  %v581_v37 = vadd.f32 %v572_v61, %v561_v8  ;;  %v582_v11 = vadd.f32 %v572_v61, %v562_v10  ;;  %v481_v32 = vpop.permute.xlu0 %480 }
  0xba   :  { %v414_v12 = vmul.f32 %v1652_v53, %v387_v33  ;;  %v415_v20 = vmul.f32 %v1655_v54, %v387_v33  ;;  %v416_v21 = vmul.f32 %v1658_v49, %v387_v33  ;;  %v417_v40 = vmul.f32 %v1661_v50, %v387_v33 }
  0xbb   :  { %v587_v43 = vmax.f32 %v579_v36, 0.0  ;;  %v588_v44 = vmax.f32 %v580_v13, 0.0  ;;  %v589_v26 = vmax.f32 %v581_v37, 0.0  ;;  %v590_v57 = vmax.f32 %v582_v11, 0.0 }
  0xbc   :  { %v434_v63 = vpop.permute.xlu1 %433  ;;  %v422_v0 = vadd.f32 %v414_v12, %v375_v34  ;;  %v423_v27 = vadd.f32 %v415_v20, %v376_v3  ;;  %v424_v1 = vadd.f32 %v416_v21, %v377_v35  ;;  %v425_v2 = vadd.f32 %v417_v40, %v378_v4 }
  0xbd   :  { %595 = vst [vmem:[#allocation4] sm:$0xff] %v587_v43  ;;  %596 = vst [vmem:[#allocation4 + $0x8] sm:$0xff] %v588_v44  ;;  %v461_v53 = vmul.f32 %v1684_v16, %v434_v63  ;;  %v462_v54 = vmul.f32 %v1687_v18, %v434_v63  ;;  %v463_v33 = vmul.f32 %v1690_v19, %v434_v63 }
  0xbe   :  { %597 = vst [vmem:[#allocation4 + $0x10] sm:$0xff] %v589_v26  ;;  %598 = vst [vmem:[#allocation4 + $0x18] sm:$0xff] %v590_v57  ;;  %v464_v49 = vmul.f32 %v1693_v42, %v434_v63  ;;  %v508_v60 = vmul.f32 %v1664_v41, %v481_v32  ;;  %v509_v61 = vmul.f32 %v1667_v52, %v481_v32 }
  0xbf   :  { %v469_v50 = vadd.f32 %v461_v53, %v422_v0  ;;  %v470_v58 = vadd.f32 %v462_v54, %v423_v27  ;;  %v471_v62 = vadd.f32 %v463_v33, %v424_v1  ;;  %v510_v14 = vmul.f32 %v1670_v55, %v481_v32 }
  0xc0   :  { %v472_v59 = vadd.f32 %v464_v49, %v425_v2  ;;  %v511_v15 = vmul.f32 %v1673_v56, %v481_v32  ;;  %v608_v56 = vpop.permute.xlu0 %607 }
  0xc1   :  { %v528_v9 = vpop.permute.xlu1 %527  ;;  %v516_v22 = vadd.f32 %v508_v60, %v469_v50  ;;  %v517_v23 = vadd.f32 %v509_v61, %v470_v58  ;;  %v518_v24 = vadd.f32 %v510_v14, %v471_v62 }
  0xc2   :  { %v555_v16 = vmul.f32 %v1708_v28, %v528_v9  ;;  %v556_v18 = vmul.f32 %v1711_v29, %v528_v9  ;;  %v557_v19 = vmul.f32 %v1714_v38, %v528_v9  ;;  %v558_v42 = vmul.f32 %v1717_v39, %v528_v9  ;;  %v1856_v38 = vld [vmem:[#allocation10_spill] sm:$0xff]  ;;  %v1857_v39 = vld [vmem:[#allocation11_spill] sm:$0xff] }
  0xc3   :  { %v519_v17 = vadd.f32 %v511_v15, %v472_v59 }
  0xc4   :  { %v563_v52 = vadd.f32 %v555_v16, %v516_v22  ;;  %v564_v46 = vadd.f32 %v556_v18, %v517_v23  ;;  %v565_v55 = vadd.f32 %v557_v19, %v518_v24  ;;  %v709_v26 = vpop.permute.xlu0 %708 }
  0xc5   :  { %v604_v45 = vld [vmem:[#allocation4] ss:$8 sm:$0xf]  ;;  %v566_v25 = vadd.f32 %v558_v42, %v519_v17  ;;  %v1755_v47 = vld [vmem:[#allocation4 + $0x3] ss:$8 sm:$0xf] }
  0xc6   :  { %v577_v41 = vpop.permute.xlu1 %576  ;;  %v614_v28 = vrot.slane %v604_v45, %v1563_v30  ;;  %v618_v29 = vrot.slane %v604_v45, %v1566_v31  ;;  %v622_v48 = vrot.slane %v604_v45, %v1856_v38  ;;  %v626_v51 = vrot.slane %v604_v45, %v1857_v39  ;;  %v636_v34 = vld [vmem:[#allocation4 + $0x1] ss:$8 sm:$0xf]  ;;  %v671_v13 = vld [vmem:[#allocation4 + $0x2] ss:$8 sm:$0xf] }
  0xc7   :  { %v583_v5 = vadd.f32 %v577_v41, %v563_v52  ;;  %v584_v6 = vadd.f32 %v577_v41, %v564_v46  ;;  %v585_v7 = vadd.f32 %v577_v41, %v565_v55  ;;  %v586_v8 = vadd.f32 %v577_v41, %v566_v25  ;;  %v811_v1 = vld [vmem:[#allocation4 + $0x6] ss:$8 sm:$0xf]  ;;  %v741_v55 = vld [vmem:[#allocation4 + $0x4] ss:$8 sm:$0xf] }
  0xc8   :  { %v715_v3 = vrot.slane %v1755_v47, %v1563_v30  ;;  %v719_v35 = vrot.slane %v1755_v47, %v1566_v31  ;;  %v723_v4 = vrot.slane %v1755_v47, %v1856_v38  ;;  %v727_v36 = vrot.slane %v1755_v47, %v1857_v39  ;;  %v814_v24 = vpop.permute.xlu0 %813 }
  0xc9   :  { %v591_v37 = vmax.f32 %v583_v5, 0.0  ;;  %v592_v11 = vmax.f32 %v584_v6, 0.0  ;;  %v593_v12 = vmax.f32 %v585_v7, 0.0  ;;  %v594_v20 = vmax.f32 %v586_v8, 0.0 }
  0xca   :  { %v645_v21 = vrot.slane %v636_v34, %v1563_v30  ;;  %v649_v40 = vrot.slane %v636_v34, %v1566_v31  ;;  %v653_v43 = vrot.slane %v636_v34, %v1856_v38  ;;  %v657_v44 = vrot.slane %v636_v34, %v1857_v39  ;;  %v776_v6 = vld [vmem:[#allocation4 + $0x5] ss:$8 sm:$0xf] }
  0xcb   :  { %v639_v10 = vpop.permute.xlu1 %638  ;;  %599 = vst [vmem:[#allocation4 + $0x20] sm:$0xff] %v591_v37  ;;  %600 = vst [vmem:[#allocation4 + $0x28] sm:$0xff] %v592_v11  ;;  %v680_v57 = vrot.slane %v671_v13, %v1563_v30  ;;  %v684_v63 = vrot.slane %v671_v13, %v1566_v31  ;;  %v688_v0 = vrot.slane %v671_v13, %v1856_v38 }
  0xcc   :  { %601 = vst [vmem:[#allocation4 + $0x30] sm:$0xff] %v593_v12  ;;  %602 = vst [vmem:[#allocation4 + $0x38] sm:$0xff] %v594_v20  ;;  %v692_v27 = vrot.slane %v671_v13, %v1857_v39  ;;  %v662_v2 = vmul.f32 %v645_v21, %v639_v10  ;;  %v663_v32 = vmul.f32 %v649_v40, %v639_v10 }
  0xcd   :  { %v664_v53 = vmul.f32 %v653_v43, %v639_v10  ;;  %v665_v54 = vmul.f32 %v657_v44, %v639_v10  ;;  %v631_v49 = vmul.f32 %v614_v28, %v608_v56  ;;  %v632_v50 = vmul.f32 %v618_v29, %v608_v56 }
  0xce   :  { %v633_v58 = vmul.f32 %v622_v48, %v608_v56  ;;  %v634_v62 = vmul.f32 %v626_v51, %v608_v56  ;;  %v820_v15 = vrot.slane %v811_v1, %v1563_v30  ;;  %v824_v9 = vrot.slane %v811_v1, %v1566_v31 }
  0xcf   :  { %v828_v16 = vrot.slane %v811_v1, %v1856_v38  ;;  %v832_v18 = vrot.slane %v811_v1, %v1857_v39  ;;  %v666_v19 = vadd.f32 %v662_v2, %v631_v49  ;;  %v667_v42 = vadd.f32 %v663_v32, %v632_v50  ;;  %v846_v1 = vld [vmem:[#allocation4 + $0x7] ss:$8 sm:$0xf] }
  0xd0   :  { %v674_v33 = vpop.permute.xlu1 %673  ;;  %v668_v22 = vadd.f32 %v664_v53, %v633_v58  ;;  %v669_v23 = vadd.f32 %v665_v54, %v634_v62  ;;  %v732_v25 = vmul.f32 %v715_v3, %v709_v26  ;;  %v733_v56 = vmul.f32 %v719_v35, %v709_v26 }
  0xd1   :  { %v697_v59 = vmul.f32 %v680_v57, %v674_v33  ;;  %v698_v60 = vmul.f32 %v684_v63, %v674_v33  ;;  %v699_v61 = vmul.f32 %v688_v0, %v674_v33  ;;  %v700_v14 = vmul.f32 %v692_v27, %v674_v33 }
  0xd2   :  { %v734_v47 = vmul.f32 %v723_v4, %v709_v26  ;;  %v735_v28 = vmul.f32 %v727_v36, %v709_v26  ;;  %v837_v29 = vmul.f32 %v820_v15, %v814_v24  ;;  %v838_v48 = vmul.f32 %v824_v9, %v814_v24 }
  0xd3   :  { %v701_v41 = vadd.f32 %v697_v59, %v666_v19  ;;  %v702_v45 = vadd.f32 %v698_v60, %v667_v42  ;;  %v703_v52 = vadd.f32 %v699_v61, %v668_v22  ;;  %v704_v46 = vadd.f32 %v700_v14, %v669_v23  ;;  %v1785_v13 = vld [vmem:[#allocation4 + $0x21] ss:$8 sm:$0xf]  ;;  %v881_v19 = vld [vmem:[#allocation4 + $0x20] ss:$8 sm:$0xf] }
  0xd4   :  { %v839_v51 = vmul.f32 %v828_v16, %v814_v24  ;;  %v840_v5 = vmul.f32 %v832_v18, %v814_v24  ;;  %v750_v7 = vrot.slane %v741_v55, %v1563_v30  ;;  %v754_v8 = vrot.slane %v741_v55, %v1566_v31 }
  0xd5   :  { %v744_v17 = vpop.permute.xlu1 %743  ;;  %v758_v10 = vrot.slane %v741_v55, %v1856_v38  ;;  %v762_v34 = vrot.slane %v741_v55, %v1857_v39  ;;  %v736_v37 = vadd.f32 %v732_v25, %v701_v41  ;;  %v737_v3 = vadd.f32 %v733_v56, %v702_v45 }
  0xd6   :  { %v738_v35 = vadd.f32 %v734_v47, %v703_v52  ;;  %v739_v4 = vadd.f32 %v735_v28, %v704_v46  ;;  %v785_v11 = vrot.slane %v776_v6, %v1563_v30  ;;  %v789_v12 = vrot.slane %v776_v6, %v1566_v31 }
  0xd7   :  { %v793_v20 = vrot.slane %v776_v6, %v1856_v38  ;;  %v797_v21 = vrot.slane %v776_v6, %v1857_v39  ;;  %v767_v40 = vmul.f32 %v750_v7, %v744_v17  ;;  %v768_v43 = vmul.f32 %v754_v8, %v744_v17 }
  0xd8   :  { %v769_v44 = vmul.f32 %v758_v10, %v744_v17  ;;  %v770_v26 = vmul.f32 %v762_v34, %v744_v17  ;;  %v925_v57 = vrot.slane %v1785_v13, %v1563_v30  ;;  %v929_v63 = vrot.slane %v1785_v13, %v1566_v31  ;;  %v919_v10 = vpop.permute.xlu0 %918 }
  0xd9   :  { %v933_v0 = vrot.slane %v1785_v13, %v1856_v38  ;;  %v937_v27 = vrot.slane %v1785_v13, %v1857_v39  ;;  %v771_v2 = vadd.f32 %v767_v40, %v736_v37  ;;  %v772_v32 = vadd.f32 %v768_v43, %v737_v3 }
  0xda   :  { %v779_v36 = vpop.permute.xlu1 %778  ;;  %v773_v53 = vadd.f32 %v769_v44, %v738_v35  ;;  %v774_v54 = vadd.f32 %v770_v26, %v739_v4  ;;  %v855_v59 = vrot.slane %v846_v1, %v1563_v30  ;;  %v859_v60 = vrot.slane %v846_v1, %v1566_v31 }
  0xdb   :  { %v802_v33 = vmul.f32 %v785_v11, %v779_v36  ;;  %v803_v49 = vmul.f32 %v789_v12, %v779_v36  ;;  %v804_v50 = vmul.f32 %v793_v20, %v779_v36  ;;  %v805_v58 = vmul.f32 %v797_v21, %v779_v36  ;;  %v1021_v20 = vld [vmem:[#allocation4 + $0x24] ss:$8 sm:$0xf] }
  0xdc   :  { %v863_v61 = vrot.slane %v846_v1, %v1856_v38  ;;  %v867_v14 = vrot.slane %v846_v1, %v1857_v39  ;;  %v890_v55 = vrot.slane %v881_v19, %v1563_v30  ;;  %v894_v25 = vrot.slane %v881_v19, %v1566_v31 }
  0xdd   :  { %v806_v15 = vadd.f32 %v802_v33, %v771_v2  ;;  %v807_v9 = vadd.f32 %v803_v49, %v772_v32  ;;  %v808_v16 = vadd.f32 %v804_v50, %v773_v53  ;;  %v809_v18 = vadd.f32 %v805_v58, %v774_v54 }
  0xde   :  { %v898_v56 = vrot.slane %v881_v19, %v1856_v38  ;;  %v902_v47 = vrot.slane %v881_v19, %v1857_v39  ;;  %v943_v37 = vmul.f32 %v929_v63, %v919_v10  ;;  %v944_v3 = vmul.f32 %v933_v0, %v919_v10  ;;  %v986_v0 = vld [vmem:[#allocation4 + $0x23] ss:$8 sm:$0xf]  ;;  %v1024_v19 = vpop.permute.xlu0 %1023 }
  0xdf   :  { %v849_v62 = vpop.permute.xlu1 %848  ;;  %v841_v17 = vadd.f32 %v837_v29, %v806_v15  ;;  %v842_v41 = vadd.f32 %v838_v48, %v807_v9  ;;  %v843_v45 = vadd.f32 %v839_v51, %v808_v16  ;;  %v844_v52 = vadd.f32 %v840_v5, %v809_v18  ;;  %v951_v51 = vld [vmem:[#allocation4 + $0x22] ss:$8 sm:$0xf] }
  0xe0   :  { %v872_v42 = vmul.f32 %v855_v59, %v849_v62  ;;  %v873_v22 = vmul.f32 %v859_v60, %v849_v62  ;;  %v874_v23 = vmul.f32 %v863_v61, %v849_v62  ;;  %v875_v24 = vmul.f32 %v867_v14, %v849_v62 }
  0xe1   :  { %v942_v5 = vmul.f32 %v925_v57, %v919_v10  ;;  %v945_v35 = vmul.f32 %v937_v27, %v919_v10  ;;  %v960_v40 = vrot.slane %v951_v51, %v1563_v30  ;;  %v964_v43 = vrot.slane %v951_v51, %v1566_v31  ;;  %v1126_v10 = vld [vmem:[#allocation4 + $0x27] ss:$8 sm:$0xf] }
  0xe2   :  { %v876_v28 = vadd.f32 %v872_v42, %v841_v17  ;;  %v877_v6 = vadd.f32 %v873_v22, %v842_v41  ;;  %v878_v7 = vadd.f32 %v874_v23, %v843_v45  ;;  %v879_v8 = vadd.f32 %v875_v24, %v844_v52  ;;  %v1056_v17 = vld [vmem:[#allocation4 + $0x25] ss:$8 sm:$0xf] }
  0xe3   :  { %v968_v44 = vrot.slane %v951_v51, %v1856_v38  ;;  %v972_v26 = vrot.slane %v951_v51, %v1857_v39  ;;  %v1030_v33 = vrot.slane %v1021_v20, %v1563_v30  ;;  %v1034_v49 = vrot.slane %v1021_v20, %v1566_v31 }
  0xe4   :  { %v884_v46 = vpop.permute.xlu1 %883  ;;  %v1038_v50 = vrot.slane %v1021_v20, %v1856_v38  ;;  %v1042_v58 = vrot.slane %v1021_v20, %v1857_v39  ;;  %v995_v62 = vrot.slane %v986_v0, %v1563_v30  ;;  %v999_v59 = vrot.slane %v986_v0, %v1566_v31 }
  0xe5   :  { %v907_v34 = vmul.f32 %v890_v55, %v884_v46  ;;  %v908_v13 = vmul.f32 %v894_v25, %v884_v46  ;;  %v909_v29 = vmul.f32 %v898_v56, %v884_v46  ;;  %v910_v48 = vmul.f32 %v902_v47, %v884_v46 }
  0xe6   :  { %v1003_v60 = vrot.slane %v986_v0, %v1856_v38  ;;  %v1007_v61 = vrot.slane %v986_v0, %v1857_v39  ;;  %v1047_v41 = vmul.f32 %v1030_v33, %v1024_v19  ;;  %v1048_v45 = vmul.f32 %v1034_v49, %v1024_v19 }
  0xe7   :  { %v911_v4 = vadd.f32 %v907_v34, %v876_v28  ;;  %v912_v36 = vadd.f32 %v908_v13, %v877_v6  ;;  %v913_v11 = vadd.f32 %v909_v29, %v878_v7  ;;  %v914_v12 = vadd.f32 %v910_v48, %v879_v8 }
  0xe8   :  { %v1049_v52 = vmul.f32 %v1038_v50, %v1024_v19  ;;  %v1050_v46 = vmul.f32 %v1042_v58, %v1024_v19  ;;  %v1065_v28 = vrot.slane %v1056_v17, %v1563_v30  ;;  %v1069_v6 = vrot.slane %v1056_v17, %v1566_v31 }
  0xe9   :  { %v954_v21 = vpop.permute.xlu1 %953  ;;  %v946_v1 = vadd.f32 %v942_v5, %v911_v4  ;;  %v947_v2 = vadd.f32 %v943_v37, %v912_v36  ;;  %v948_v57 = vadd.f32 %v944_v3, %v913_v11  ;;  %v949_v63 = vadd.f32 %v945_v35, %v914_v12  ;;  %v1091_v4 = vld [vmem:[#allocation4 + $0x26] ss:$8 sm:$0xf] }
  0xea   :  { %v977_v27 = vmul.f32 %v960_v40, %v954_v21  ;;  %v978_v32 = vmul.f32 %v964_v43, %v954_v21  ;;  %v979_v53 = vmul.f32 %v968_v44, %v954_v21  ;;  %v980_v54 = vmul.f32 %v972_v26, %v954_v21  ;;  %v1129_v21 = vpop.permute.xlu0 %1128 }
  0xeb   :  { %v1073_v7 = vrot.slane %v1056_v17, %v1856_v38  ;;  %v1077_v8 = vrot.slane %v1056_v17, %v1857_v39  ;;  %v1135_v36 = vrot.slane %v1126_v10, %v1563_v30  ;;  %v1139_v11 = vrot.slane %v1126_v10, %v1566_v31 }
  0xec   :  { %v981_v14 = vadd.f32 %v977_v27, %v946_v1  ;;  %v982_v15 = vadd.f32 %v978_v32, %v947_v2  ;;  %v983_v9 = vadd.f32 %v979_v53, %v948_v57  ;;  %v984_v16 = vadd.f32 %v980_v54, %v949_v63 }
  0xed   :  { %v1143_v12 = vrot.slane %v1126_v10, %v1856_v38  ;;  %v1147_v20 = vrot.slane %v1126_v10, %v1857_v39  ;;  %v1100_v40 = vrot.slane %v1091_v4, %v1563_v30  ;;  %v1104_v43 = vrot.slane %v1091_v4, %v1566_v31 }
  0xee   :  { %v989_v18 = vpop.permute.xlu1 %988  ;;  %v1108_v44 = vrot.slane %v1091_v4, %v1856_v38  ;;  %v1112_v26 = vrot.slane %v1091_v4, %v1857_v39  ;;  %v1152_v33 = vmul.f32 %v1135_v36, %v1129_v21  ;;  %v1153_v49 = vmul.f32 %v1139_v11, %v1129_v21 }
  0xef   :  { %v1012_v42 = vmul.f32 %v995_v62, %v989_v18  ;;  %v1013_v22 = vmul.f32 %v999_v59, %v989_v18  ;;  %v1014_v23 = vmul.f32 %v1003_v60, %v989_v18  ;;  %v1015_v24 = vmul.f32 %v1007_v61, %v989_v18 }
  0xf0   :  { %v1154_v50 = vmul.f32 %v1143_v12, %v1129_v21  ;;  %v1155_v58 = vmul.f32 %v1147_v20, %v1129_v21 }
  0xf1   :  { %v1016_v55 = vadd.f32 %v1012_v42, %v981_v14  ;;  %v1017_v25 = vadd.f32 %v1013_v22, %v982_v15  ;;  %v1018_v56 = vadd.f32 %v1014_v23, %v983_v9  ;;  %v1019_v47 = vadd.f32 %v1015_v24, %v984_v16 }
  0xf3   :  { %v1059_v34 = vpop.permute.xlu1 %1058  ;;  %v1051_v13 = vadd.f32 %v1047_v41, %v1016_v55  ;;  %v1052_v29 = vadd.f32 %v1048_v45, %v1017_v25  ;;  %v1053_v48 = vadd.f32 %v1049_v52, %v1018_v56  ;;  %v1054_v51 = vadd.f32 %v1050_v46, %v1019_v47  ;;  %v1274_v41 = vpop.permute.xlu0 %1273 }
  0xf4   :  { %v1082_v5 = vmul.f32 %v1065_v28, %v1059_v34  ;;  %v1083_v37 = vmul.f32 %v1069_v6, %v1059_v34  ;;  %v1084_v3 = vmul.f32 %v1073_v7, %v1059_v34  ;;  %v1085_v35 = vmul.f32 %v1077_v8, %v1059_v34 }
  0xf5   :  { %v1279_v25 = vrot.slane %v1274_v41, %v1563_v30 }
  0xf6   :  { %v1086_v1 = vadd.f32 %v1082_v5, %v1051_v13  ;;  %v1087_v2 = vadd.f32 %v1083_v37, %v1052_v29  ;;  %v1088_v57 = vadd.f32 %v1084_v3, %v1053_v48  ;;  %v1089_v63 = vadd.f32 %v1085_v35, %v1054_v51 }
  0xf8   :  { %v1094_v0 = vpop.permute.xlu1 %1093 }
  0xf9   :  { %v1117_v27 = vmul.f32 %v1100_v40, %v1094_v0  ;;  %v1118_v32 = vmul.f32 %v1104_v43, %v1094_v0  ;;  %v1119_v53 = vmul.f32 %v1108_v44, %v1094_v0  ;;  %v1120_v54 = vmul.f32 %v1112_v26, %v1094_v0 }
  0xfb   :  { %v1121_v62 = vadd.f32 %v1117_v27, %v1086_v1  ;;  %v1122_v59 = vadd.f32 %v1118_v32, %v1087_v2  ;;  %v1123_v31 = vadd.f32 %v1119_v53, %v1088_v57  ;;  %v1124_v60 = vadd.f32 %v1120_v54, %v1089_v63 }
  0xfd   :  { %v1164_v38 = vpop.permute.xlu1 %1163  ;;  %v1156_v61 = vadd.f32 %v1152_v33, %v1121_v62  ;;  %v1157_v39 = vadd.f32 %v1153_v49, %v1122_v59  ;;  %v1158_v14 = vadd.f32 %v1154_v50, %v1123_v31  ;;  %v1159_v15 = vadd.f32 %v1155_v58, %v1124_v60 }
  0xff   :  { %v1166_v9 = vadd.f32 %v1164_v38, %v1156_v61  ;;  %v1167_v16 = vadd.f32 %v1164_v38, %v1157_v39  ;;  %v1168_v18 = vadd.f32 %v1164_v38, %v1158_v14  ;;  %v1169_v19 = vadd.f32 %v1164_v38, %v1159_v15 }
 0x101   :  { %v1170_v42 = vmax.f32 %v1166_v9, 0.0  ;;  %v1171_v22 = vmax.f32 %v1167_v16, 0.0  ;;  %v1172_v23 = vmax.f32 %v1168_v18, 0.0  ;;  %v1173_v24 = vmax.f32 %v1169_v19, 0.0  ;;  %v1177_v17 = vpop.permute.xlu1 %1176 }
 0x103   :  { %v1179_v45 = vmul.f32 %v1177_v17, %v1170_v42  ;;  %v1180_v52 = vmul.f32 %v1177_v17, %v1171_v22  ;;  %v1181_v46 = vmul.f32 %v1177_v17, %v1172_v23  ;;  %v1182_v55 = vmul.f32 %v1177_v17, %v1173_v24 }
 0x105   :  { %v1187_v56 = vrot.slane %v1179_v45, 1  ;;  %v1188_v47 = vrot.slane %v1180_v52, 1  ;;  %v1189_v28 = vrot.slane %v1181_v46, 1  ;;  %v1190_v6 = vrot.slane %v1182_v55, 1 }
 0x106   :  { %v1199_v7 = vrot.slane %v1179_v45, 2  ;;  %v1200_v8 = vrot.slane %v1180_v52, 2  ;;  %v1201_v10 = vrot.slane %v1181_v46, 2  ;;  %v1202_v34 = vrot.slane %v1182_v55, 2 }
 0x107   :  { %v1195_v13 = vadd.f32 %v1187_v56, %v1179_v45  ;;  %v1196_v29 = vadd.f32 %v1188_v47, %v1180_v52  ;;  %v1197_v48 = vadd.f32 %v1189_v28, %v1181_v46  ;;  %v1198_v51 = vadd.f32 %v1190_v6, %v1182_v55 }
 0x108   :  { %v1211_v5 = vrot.slane %v1179_v45, 3  ;;  %v1212_v37 = vrot.slane %v1180_v52, 3  ;;  %v1213_v3 = vrot.slane %v1181_v46, 3  ;;  %v1214_v35 = vrot.slane %v1182_v55, 3 }
 0x109   :  { %v1207_v4 = vadd.f32 %v1199_v7, %v1195_v13  ;;  %v1208_v36 = vadd.f32 %v1200_v8, %v1196_v29  ;;  %v1209_v11 = vadd.f32 %v1201_v10, %v1197_v48  ;;  %v1210_v30 = vadd.f32 %v1202_v34, %v1198_v51 }
 0x10a   :  { %v1223_v12 = vrot.slane %v1179_v45, 4  ;;  %v1224_v20 = vrot.slane %v1180_v52, 4  ;;  %v1225_v21 = vrot.slane %v1181_v46, 4  ;;  %v1226_v40 = vrot.slane %v1182_v55, 4 }
 0x10b   :  { %v1219_v43 = vadd.f32 %v1211_v5, %v1207_v4  ;;  %v1220_v44 = vadd.f32 %v1212_v37, %v1208_v36  ;;  %v1221_v26 = vadd.f32 %v1213_v3, %v1209_v11  ;;  %v1222_v1 = vadd.f32 %v1214_v35, %v1210_v30  ;;  %v1858_v4 = vld [vmem:[#allocation9_spill] sm:$0xff] }
 0x10c   :  { %v1235_v2 = vrot.slane %v1179_v45, 5  ;;  %v1236_v57 = vrot.slane %v1180_v52, 5  ;;  %v1237_v63 = vrot.slane %v1181_v46, 5  ;;  %v1238_v0 = vrot.slane %v1182_v55, 5 }
 0x10d   :  { %v1231_v27 = vadd.f32 %v1223_v12, %v1219_v43  ;;  %v1232_v32 = vadd.f32 %v1224_v20, %v1220_v44  ;;  %v1233_v53 = vadd.f32 %v1225_v21, %v1221_v26  ;;  %v1234_v54 = vadd.f32 %v1226_v40, %v1222_v1 }
 0x10e   :  { %v1247_v33 = vrot.slane %v1179_v45, 6  ;;  %v1248_v49 = vrot.slane %v1180_v52, 6  ;;  %v1249_v50 = vrot.slane %v1181_v46, 6  ;;  %v1250_v58 = vrot.slane %v1182_v55, 6 }
 0x10f   :  { %v1243_v62 = vadd.f32 %v1235_v2, %v1231_v27  ;;  %v1244_v59 = vadd.f32 %v1236_v57, %v1232_v32  ;;  %v1245_v31 = vadd.f32 %v1237_v63, %v1233_v53  ;;  %v1246_v60 = vadd.f32 %v1238_v0, %v1234_v54 }
 0x110   :  { %v1259_v38 = vrot.slane %v1179_v45, 7  ;;  %v1260_v61 = vrot.slane %v1180_v52, 7  ;;  %v1261_v39 = vrot.slane %v1181_v46, 7  ;;  %v1262_v14 = vrot.slane %v1182_v55, 7 }
 0x111   :  { %v1255_v15 = vadd.f32 %v1247_v33, %v1243_v62  ;;  %v1256_v9 = vadd.f32 %v1248_v49, %v1244_v59  ;;  %v1257_v16 = vadd.f32 %v1249_v50, %v1245_v31  ;;  %v1258_v18 = vadd.f32 %v1250_v58, %v1246_v60 }
 0x112   :  { %v1462_v5 = vmov 1966171168   ;;  %v1859_v26 = vlaneseq }
 0x113   :  { %v1267_v19 = vadd.f32 %v1259_v38, %v1255_v15  ;;  %v1268_v42 = vadd.f32 %v1260_v61, %v1256_v9  ;;  %v1269_v22 = vadd.f32 %v1261_v39, %v1257_v16  ;;  %v1270_v23 = vadd.f32 %v1262_v14, %v1258_v18 }
 0x114   :  { %v1311_v37 = vunpack.c.l.s4 %v1462_v5  ;;  %vm1335_vm0 = vcmp.lt.s32.totalorder %v1859_v26, 512 }
 0x115   :  { %v1280_v24 = vadd.f32 %v1279_v25, %v1267_v19  ;;  %v1281_v17 = vadd.f32 %v1279_v25, %v1268_v42  ;;  %v1282_v41 = vadd.f32 %v1279_v25, %v1269_v22  ;;  %v1283_v56 = vadd.f32 %v1279_v25, %v1270_v23 }
 0x116   :  { %v1312_v3 = vunpack.c.0.s8 %v1311_v37 }
 0x117   :  { %v1284_v47 = vsub.f32 0.0, %v1280_v24  ;;  %v1285_v28 = vsub.f32 0.0, %v1281_v17  ;;  %v1286_v6 = vsub.f32 0.0, %v1282_v41  ;;  %v1287_v7 = vsub.f32 0.0, %v1283_v56 }
 0x118   :  { %v1315_v36 = vsub.s32 %v1312_v3, %v1858_v4 }
 0x119   :  { %v1288_v45 = vmul.f32 1.442695, %v1284_v47  ;;  %v1290_v52 = vmul.f32 1.442695, %v1285_v28  ;;  %v1292_v46 = vmul.f32 1.442695, %v1286_v6 }
 0x11a   :  { %v1294_v55 = vmul.f32 1.442695, %v1287_v7 }
 0x11b   :  { %1408 = vpow2.f32 %v1288_v45 }
 0x11c   :  { %1410 = vpow2.f32 %v1290_v52 }
 0x11d   :  { %1412 = vpow2.f32 %v1292_v46 }
 0x11e   :  { %1414 = vpow2.f32 %v1294_v55 }
 0x128   :  { %v1409_v8 = vpop.eup %1408 }
 0x129   :  { %v1411_v10 = vpop.eup %1410  ;;  %v1296_v34 = vadd.f32 1.0, %v1409_v8 }
 0x12a   :  { %v1413_v13 = vpop.eup %1412  ;;  %v1297_v29 = vadd.f32 1.0, %v1411_v10 }
 0x12b   :  { %v1415_v48 = vpop.eup %1414  ;;  %v1298_v51 = vadd.f32 1.0, %v1413_v13  ;;  %1416 = vrcp.f32 %v1296_v34 }
 0x12c   :  { %v1299_v25 = vadd.f32 1.0, %v1415_v48  ;;  %1418 = vrcp.f32 %v1297_v29 }
 0x12d   :  { %1420 = vrcp.f32 %v1298_v51 }
 0x12e   :  { %1422 = vrcp.f32 %v1299_v25 }
 0x138   :  { %v1417_v35 = vpop.eup %1416 }
 0x139   :  { %v1419_v11 = vpop.eup %1418 }
 0x13a   :  { %v1421_v30 = vpop.eup %1420  ;;  %v1308_v12 = vcombine.low %v1417_v35, %v1419_v11 }
 0x13b   :  { %v1423_v20 = vpop.eup %1422 }
 0x13c   :  { %v1309_v21 = vcombine.low %v1421_v30, %v1423_v20  ;;  %v1316_v40 = vrot.slane %v1308_v12, %v1315_v36 }
 0x13e   :  { %v1323_v43 = vrot.slane %v1309_v21, %v1315_v36 }
 0x140   :  { %v1324_v44 = vcombine.low %v1316_v40, %v1323_v43 }
 0x142   :  { %v1331_v1 = vrot.slane %v1324_v44, %v1315_v36 }
 0x144   :  { %1337 = vst.msk [vmem:[#allocation6] sm:$0xf] %vm1335_vm0, %v1331_v1 }
 0x145   :  { %1435 = shalt.err (!%p1432_p4)
}
 0x146   :  { %1347 = dma.vmem_to_hbm [thread:$0]  %s1345_s25, 64, %s1846_s9, [#allocation7]  }
 0x147   :  { %1444 = dma.done.wait [#allocation7], 64  }
 0x148   :  { %1445 = vsyncadd [#allocation7], 4294967232 }
 0x149   :  { %1351 = vsyncpa [#allocation7], 1 }

</bundles_post_ra>
